<compile_context>
chip_gen: v7x
topology: tpu7x:2x2x1
jax: 0.10.0
libtpu: 0.0.40
codegen_flags: <defaults>
</compile_context>

<pallas_src>
import functools

import jax
import jax.numpy as jnp
from jax import lax
from jax.experimental import pallas as pl
from jax.experimental.pallas import tpu as pltpu

LN_EPS = 1e-5  # PyTorch nn.LayerNorm default


# ----------------------------- in-kernel helpers -----------------------------
def _layernorm(x, gamma, beta):
    mu = jnp.mean(x, axis=-1, keepdims=True)
    var = jnp.mean(jnp.square(x - mu), axis=-1, keepdims=True)
    return (x - mu) * lax.rsqrt(var + LN_EPS) * gamma + beta


def _gelu_exact(x):
    # F.gelu default (erf-based)
    return 0.5 * x * (1.0 + lax.erf(x * 0.7071067811865476))


# ------------------------------ fused kernel ----------------------------------
def _encoder_kernel(x_ref, pos_ref,
                    ln0_g_ref, ln0_b_ref, w_qkv_ref, w_proj_ref, b_proj_ref,
                    ln1_g_ref, ln1_b_ref, w_fc1_ref, b_fc1_ref,
                    w_fc2_ref, b_fc2_ref,
                    norm_g_ref, norm_b_ref, pool_w_ref, pool_b_ref,
                    fc_w_ref, fc_b_ref,
                    out_ref, act_ref):
    """One encoder layer per grid step; prologue/epilogue gated with pl.when."""
    l = pl.program_id(1)
    n_layers = pl.num_programs(1)
    bb, N, C = act_ref.shape
    H = w_qkv_ref.shape[0]
    Dh = w_qkv_ref.shape[2] // 3
    T = bb * N
    bf16 = jnp.bfloat16

    # ---- prologue: positional embedding add (dropout = identity in eval) ----
    @pl.when(l == 0)
    def _():
        act_ref[...] = x_ref[...] + pos_ref[...]

    x = act_ref[...]                                                # (bb, N, C) f32

    # ---- pre-norm multi-head self-attention ----
    xn = _layernorm(x, ln0_g_ref[...], ln0_b_ref[...])              # f32
    xn2 = xn.reshape(T, C).astype(bf16)
    xn_h = jnp.broadcast_to(xn2[None], (H, T, C))                   # (H, T, C) bf16

    # per-head fused qkv projection: one rank-3 batched matmul over heads
    # (Q columns of w_qkv were pre-scaled by Dh**-0.5 host-side)
    qkv = jnp.einsum('htc,hcx->htx', xn_h, w_qkv_ref[...],
                     preferred_element_type=jnp.float32)            # (H, T, 3*Dh)
    q = qkv[:, :, 0 * Dh:1 * Dh].astype(bf16).reshape(H * bb, N, Dh)
    k = qkv[:, :, 1 * Dh:2 * Dh].astype(bf16).reshape(H * bb, N, Dh)
    v = qkv[:, :, 2 * Dh:3 * Dh].astype(bf16).reshape(H * bb, N, Dh)

    s = jnp.einsum('znd,zmd->znm', q, k,
                   preferred_element_type=jnp.float32)              # (H*bb, N, N)
    s = s - jnp.max(s, axis=-1, keepdims=True)
    p = jnp.exp(s)
    p = p / jnp.sum(p, axis=-1, keepdims=True)                      # exact softmax (f32)
    ctx = jnp.einsum('znm,zmd->znd', p.astype(bf16), v,
                     preferred_element_type=jnp.float32)            # (H*bb, N, Dh)

    # head recombination folded into the output projection (no concat):
    ctx_h = ctx.reshape(H, T, Dh).astype(bf16)
    proj_h = jnp.einsum('htd,hdc->htc', ctx_h, w_proj_ref[...],
                        preferred_element_type=jnp.float32)         # (H, T, C)
    attn = jnp.sum(proj_h, axis=0) + b_proj_ref[...]                # (T, C)

    # residual + norm1 (drop_path / dropout identity in eval)
    src = x + attn.reshape(bb, N, C)
    src = _layernorm(src, ln1_g_ref[...], ln1_b_ref[...])

    # ---- MLP ----
    src2 = src.reshape(T, C).astype(bf16)
    h1 = jnp.dot(src2, w_fc1_ref[...],
                 preferred_element_type=jnp.float32) + b_fc1_ref[...]
    h1 = _gelu_exact(h1)
    h2 = jnp.dot(h1.astype(bf16), w_fc2_ref[...],
                 preferred_element_type=jnp.float32) + b_fc2_ref[...]
    new_act = src + h2.reshape(bb, N, C)
    act_ref[...] = new_act

    # ---- epilogue: final LN + seq_pool (attention pooling) + classifier ----
    @pl.when(l == n_layers - 1)
    def _():
        y = _layernorm(new_act, norm_g_ref[...], norm_b_ref[...])   # (bb, N, C)
        logits = jnp.sum(y * pool_w_ref[...], axis=-1, keepdims=True) + pool_b_ref[...]
        logits = logits - jnp.max(logits, axis=1, keepdims=True)    # softmax over seq
        wgt = jnp.exp(logits)
        wgt = wgt / jnp.sum(wgt, axis=1, keepdims=True)
        pooled = jnp.sum(wgt * y, axis=1)                           # (bb, C)
        cls = jnp.dot(pooled.astype(bf16), fc_w_ref[...],
                      preferred_element_type=jnp.float32) + fc_b_ref[...]
        out_ref[...] = cls[:, None, :].astype(out_ref.dtype)        # (bb, 1, NC)


# ------------------------------ wrapper ----------------------------------------
def transformer_classifier_forward(x, packed, *, batch_block=1):
    B, N, C = x.shape
    L = packed["ln0_g"].shape[0]
    H = packed["w_qkv_h"].shape[1]
    X3 = packed["w_qkv_h"].shape[3]          # 3*Dh
    FF = packed["w_fc1_t"].shape[-1]
    num_classes = packed["fc_w_t"].shape[-1]
    bb = batch_block
    assert B % bb == 0

    sq = pl.Squeezed()

    def layer_spec(shape):
        # stacked per-layer weight (L, *shape): stream one layer per grid step
        return pl.BlockSpec((sq,) + shape,
                            lambda b, l, _s=shape: (l,) + (0,) * len(_s))

    def fixed_spec(shape):
        return pl.BlockSpec(shape, lambda b, l, _s=shape: (0,) * len(_s))

    in_specs = [
        pl.BlockSpec((bb, N, C), lambda b, l: (b, 0, 0)),            # x
        fixed_spec((1, N, C)),                                        # pos_emb
        layer_spec((1, C)), layer_spec((1, C)),                       # ln0 g/b
        layer_spec((H, C, X3)),                                       # w_qkv per-head
        layer_spec((H, X3 // 3, C)),                                  # w_proj per-head
        layer_spec((1, C)),                                           # b_proj
        layer_spec((1, C)), layer_spec((1, C)),                       # ln1 g/b
        layer_spec((C, FF)), layer_spec((1, FF)),                     # fc1 w/b
        layer_spec((FF, C)), layer_spec((1, C)),                      # fc2 w/b
        fixed_spec((1, C)), fixed_spec((1, C)),                       # final norm g/b
        fixed_spec((1, 1, C)), fixed_spec((1, 1, 1)),                 # pool w/b
        fixed_spec((C, num_classes)), fixed_spec((1, num_classes)),   # fc w/b
    ]
    out_spec = pl.BlockSpec((bb, 1, num_classes), lambda b, l: (b, 0, 0))

    args = (x, packed["pos_emb"],
            packed["ln0_g"], packed["ln0_b"], packed["w_qkv_h"], packed["w_proj_h"],
            packed["b_proj"], packed["ln1_g"], packed["ln1_b"],
            packed["w_fc1_t"], packed["b_fc1"], packed["w_fc2_t"], packed["b_fc2"],
            packed["norm_g"], packed["norm_b"], packed["pool_w"], packed["pool_b"],
            packed["fc_w_t"], packed["fc_b"])

    out = pl.pallas_call(
        _encoder_kernel,
        out_shape=jax.ShapeDtypeStruct((B, 1, num_classes), x.dtype),
        grid_spec=pltpu.PrefetchScalarGridSpec(
            num_scalar_prefetch=0,
            grid=(B // bb, L),
            in_specs=in_specs,
            out_specs=out_spec,
            scratch_shapes=[pltpu.VMEM((bb, N, C), jnp.float32)],     # resident activation
        ),
        compiler_params=pltpu.CompilerParams(
            dimension_semantics=("parallel", "arbitrary"),            # batch || layers seq
            vmem_limit_bytes=48 * 1024 * 1024,                        # fits v7x 64 MiB budget
        ),
    )(*args)
    return out.reshape(B, num_classes)


# ------------------------------ host-side packing ------------------------------
def pack_params(params, num_heads):
    """One-time packing: per-layer weights stacked along a leading layer axis,
    pre-transposed to (in, out), qkv/proj split per head (Q pre-scaled), matmul
    weights cast to bf16."""
    layers = params["layers"]
    C = layers[0]["qkv_w"].shape[1]
    H = num_heads
    Dh = C // H
    scale = Dh ** -0.5
    wdt = jnp.bfloat16

    def qkv_heads(w):                     # (3C, C) torch layout -> (H, C, 3*Dh)
        w3 = w.reshape(3, H, Dh, C)
        w3 = jnp.transpose(w3, (1, 3, 0, 2)).reshape(H, C, 3 * Dh)
        return w3.at[:, :, :Dh].multiply(scale)   # fold attention scale into Q

    def proj_heads(w):                    # (C, C) -> (H, Dh, C)
        return w.T.reshape(H, Dh, C)

    ident = lambda a: a
    stk = lambda f, key: jnp.stack([f(lp[key]) for lp in layers], axis=0)

    return dict(
        pos_emb=params["pos_emb"],                                   # (1, N, C) f32
        ln0_g=stk(ident, "ln0_g"), ln0_b=stk(ident, "ln0_b"),        # (L, 1, C)
        w_qkv_h=stk(qkv_heads, "qkv_w").astype(wdt),                 # (L, H, C, 3Dh)
        w_proj_h=stk(proj_heads, "proj_w").astype(wdt),              # (L, H, Dh, C)
        b_proj=stk(ident, "proj_b"),                                 # (L, 1, C)
        ln1_g=stk(ident, "ln1_g"), ln1_b=stk(ident, "ln1_b"),        # (L, 1, C)
        w_fc1_t=stk(lambda a: a.T, "fc1_w").astype(wdt),             # (L, C, FF)
        b_fc1=stk(ident, "fc1_b"),                                   # (L, 1, FF)
        w_fc2_t=stk(lambda a: a.T, "fc2_w").astype(wdt),             # (L, FF, C)
        b_fc2=stk(ident, "fc2_b"),                                   # (L, 1, C)
        norm_g=params["norm_g"], norm_b=params["norm_b"],            # (1, C)
        pool_w=params["pool_w"].reshape(1, 1, -1),                   # (1, 1, C)
        pool_b=params["pool_b"].reshape(1, 1, 1),                    # (1, 1, 1)
        fc_w_t=params["fc_w"].T.astype(wdt),                         # (C, num_classes)
        fc_b=params["fc_b"],                                         # (1, num_classes)
    )


# ------------------------------ parameters ------------------------------------
def sinusoidal_embedding(n_channels, dim):
    p = jnp.arange(n_channels, dtype=jnp.float32)[:, None]
    i = jnp.arange(dim, dtype=jnp.float32)[None, :]
    angle = p / jnp.power(10000.0, (2.0 * jnp.floor(i / 2.0)) / dim)
    even = (jnp.arange(dim) % 2 == 0)[None, :]
    pe = jnp.where(even, jnp.sin(angle), jnp.cos(angle))
    return pe[None]                                                  # (1, n, dim)


def init_params(key, *, embedding_dim, num_layers, num_heads, mlp_ratio,
                num_classes, sequence_length):
    C = embedding_dim
    FF = int(C * mlp_ratio)

    def tn(k, shape, std=0.02):
        return (std * jax.random.truncated_normal(k, -2.0, 2.0, shape)).astype(jnp.float32)

    keys = jax.random.split(key, 4 * num_layers + 2)
    layers = []
    for li in range(num_layers):
        k0, k1, k2, k3 = keys[4 * li:4 * li + 4]
        layers.append(dict(
            ln0_g=jnp.ones((1, C), jnp.float32),  ln0_b=jnp.zeros((1, C), jnp.float32),
            qkv_w=tn(k0, (3 * C, C)),
            proj_w=tn(k1, (C, C)),                proj_b=jnp.zeros((1, C), jnp.float32),
            ln1_g=jnp.ones((1, C), jnp.float32),  ln1_b=jnp.zeros((1, C), jnp.float32),
            fc1_w=tn(k2, (FF, C)),                fc1_b=jnp.zeros((1, FF), jnp.float32),
            fc2_w=tn(k3, (C, FF)),                fc2_b=jnp.zeros((1, C), jnp.float32),
        ))
    k_pool, k_fc = keys[-2], keys[-1]
    return dict(
        pos_emb=sinusoidal_embedding(sequence_length, C),
        layers=layers,
        norm_g=jnp.ones((1, C), jnp.float32),  norm_b=jnp.zeros((1, C), jnp.float32),
        pool_w=tn(k_pool, (1, C)),             pool_b=jnp.zeros((1, 1), jnp.float32),
        fc_w=tn(k_fc, (num_classes, C)),       fc_b=jnp.zeros((1, num_classes), jnp.float32),
    )


# --------------------------------- main ----------------------------------------
if __name__ == "__main__":
    B, N, C = 2, 8, 32           # batch, sequence_length, embedding_dim
    num_heads = 4
    num_layers = 2
    mlp_ratio = 4.0
    num_classes = 10

    key = jax.random.PRNGKey(0)
    k_x, k_p = jax.random.split(key)
    x = jax.random.normal(k_x, (B, N, C), jnp.float32)

    params = init_params(k_p, embedding_dim=C, num_layers=num_layers,
                         num_heads=num_heads, mlp_ratio=mlp_ratio,
                         num_classes=num_classes, sequence_length=N)
    packed = pack_params(params, num_heads)   # one-time stacking / transposition / bf16 cast

    out = transformer_classifier_forward(x, packed, batch_block=1)
    out = jax.block_until_ready(out)
    assert out.shape == (B, num_classes) and out.dtype == jnp.float32
    print("KERNEL_OK")
</pallas_src>

<mosaic_0001>
module attributes {stable_mosaic.version = 11 : i64} {
  func.func @_encoder_kernel(%arg0: i32, %arg1: i32, %arg2: memref<1x8x32xf32, #tpu.memory_space<vmem>>, %arg3: memref<1x8x32xf32, #tpu.memory_space<vmem>>, %arg4: memref<1x1x32xf32, #tpu.memory_space<vmem>>, %arg5: memref<1x1x32xf32, #tpu.memory_space<vmem>>, %arg6: memref<1x4x32x24xbf16, #tpu.memory_space<vmem>>, %arg7: memref<1x4x8x32xbf16, #tpu.memory_space<vmem>>, %arg8: memref<1x1x32xf32, #tpu.memory_space<vmem>>, %arg9: memref<1x1x32xf32, #tpu.memory_space<vmem>>, %arg10: memref<1x1x32xf32, #tpu.memory_space<vmem>>, %arg11: memref<1x32x128xbf16, #tpu.memory_space<vmem>>, %arg12: memref<1x1x128xf32, #tpu.memory_space<vmem>>, %arg13: memref<1x128x32xbf16, #tpu.memory_space<vmem>>, %arg14: memref<1x1x32xf32, #tpu.memory_space<vmem>>, %arg15: memref<1x32xf32, #tpu.memory_space<vmem>>, %arg16: memref<1x32xf32, #tpu.memory_space<vmem>>, %arg17: memref<1x1x32xf32, #tpu.memory_space<vmem>>, %arg18: memref<1x1x1xf32, #tpu.memory_space<vmem>>, %arg19: memref<32x10xbf16, #tpu.memory_space<vmem>>, %arg20: memref<1x10xf32, #tpu.memory_space<vmem>>, %arg21: memref<1x1x10xf32, #tpu.memory_space<vmem>>, %arg22: memref<1x8x32xf32, #tpu.memory_space<vmem>>) attributes {dimension_semantics = [#tpu.dimension_semantics<parallel>, #tpu.dimension_semantics<arbitrary>], iteration_bounds = array<i64: 2, 2>, scalar_prefetch = 0 : i64, scratch_operands = 1 : i64, tpu.core_type = #tpu.core_type<tc>, window_params = [{transform_indices = @transform_0, window_bounds = array<i64: 1, 8, 32>}, {pipeline_mode = #tpu.pipeline_mode<synchronous>, transform_indices = @transform_1, window_bounds = array<i64: 1, 8, 32>}, {transform_indices = @transform_2, window_bounds = array<i64: 1, 1, 32>}, {transform_indices = @transform_3, window_bounds = array<i64: 1, 1, 32>}, {transform_indices = @transform_4, window_bounds = array<i64: 1, 4, 32, 24>}, {transform_indices = @transform_5, window_bounds = array<i64: 1, 4, 8, 32>}, {transform_indices = @transform_6, window_bounds = array<i64: 1, 1, 32>}, {transform_indices = @transform_7, window_bounds = array<i64: 1, 1, 32>}, {transform_indices = @transform_8, window_bounds = array<i64: 1, 1, 32>}, {transform_indices = @transform_9, window_bounds = array<i64: 1, 32, 128>}, {transform_indices = @transform_10, window_bounds = array<i64: 1, 1, 128>}, {transform_indices = @transform_11, window_bounds = array<i64: 1, 128, 32>}, {transform_indices = @transform_12, window_bounds = array<i64: 1, 1, 32>}, {pipeline_mode = #tpu.pipeline_mode<synchronous>, transform_indices = @transform_13, window_bounds = array<i64: 1, 32>}, {pipeline_mode = #tpu.pipeline_mode<synchronous>, transform_indices = @transform_14, window_bounds = array<i64: 1, 32>}, {pipeline_mode = #tpu.pipeline_mode<synchronous>, transform_indices = @transform_15, window_bounds = array<i64: 1, 1, 32>}, {pipeline_mode = #tpu.pipeline_mode<synchronous>, transform_indices = @transform_16, window_bounds = array<i64: 1, 1, 1>}, {pipeline_mode = #tpu.pipeline_mode<synchronous>, transform_indices = @transform_17, window_bounds = array<i64: 32, 10>}, {pipeline_mode = #tpu.pipeline_mode<synchronous>, transform_indices = @transform_18, window_bounds = array<i64: 1, 10>}, {transform_indices = @transform_19, window_bounds = array<i64: 1, 1, 10>}]} {
    %c0_i32 = arith.constant 0 : i32
    %0 = arith.cmpi eq, %arg1, %c0_i32 : i32
    %1 = arith.extui %0 : i1 to i32
    %c0_i32_0 = arith.constant 0 : i32
    %2 = arith.cmpi ne, %1, %c0_i32_0 : i32
    scf.if %2 {
      %c0_63 = arith.constant 0 : index
      %c0_64 = arith.constant 0 : index
      %c0_65 = arith.constant 0 : index
      %128 = vector.load %arg2[%c0_63, %c0_64, %c0_65] : memref<1x8x32xf32, #tpu.memory_space<vmem>>, vector<1x8x32xf32>
      %c0_66 = arith.constant 0 : index
      %c0_67 = arith.constant 0 : index
      %c0_68 = arith.constant 0 : index
      %129 = vector.load %arg3[%c0_66, %c0_67, %c0_68] : memref<1x8x32xf32, #tpu.memory_space<vmem>>, vector<1x8x32xf32>
      %130 = arith.addf %128, %129 : vector<1x8x32xf32>
      %c0_69 = arith.constant 0 : index
      %c0_70 = arith.constant 0 : index
      %c0_71 = arith.constant 0 : index
      %131 = vector.load %arg22[%c0_69, %c0_70, %c0_71] : memref<1x8x32xf32, #tpu.memory_space<vmem>>, vector<1x8x32xf32>
      tpu.vector_store %arg22[%c0_69, %c0_70, %c0_71], %130 {strides = array<i32>} : memref<1x8x32xf32, #tpu.memory_space<vmem>>, vector<1x8x32xf32>,
    } else {
    }
    %c0 = arith.constant 0 : index
    %c0_1 = arith.constant 0 : index
    %c0_2 = arith.constant 0 : index
    %3 = vector.load %arg22[%c0, %c0_1, %c0_2] : memref<1x8x32xf32, #tpu.memory_space<vmem>>, vector<1x8x32xf32>
    %c0_3 = arith.constant 0 : index
    %c0_4 = arith.constant 0 : index
    %c0_5 = arith.constant 0 : index
    %4 = vector.load %arg4[%c0_3, %c0_4, %c0_5] : memref<1x1x32xf32, #tpu.memory_space<vmem>>, vector<1x1x32xf32>
    %5 = vector.shape_cast %4 : vector<1x1x32xf32> to vector<1x32xf32>
    %c0_6 = arith.constant 0 : index
    %c0_7 = arith.constant 0 : index
    %c0_8 = arith.constant 0 : index
    %6 = vector.load %arg5[%c0_6, %c0_7, %c0_8] : memref<1x1x32xf32, #tpu.memory_space<vmem>>, vector<1x1x32xf32>
    %7 = vector.shape_cast %6 : vector<1x1x32xf32> to vector<1x32xf32>
    %cst = arith.constant dense<0.000000e+00> : vector<1x8xf32>
    %8 = vector.multi_reduction <add>, %3, %cst [2] : vector<1x8x32xf32> to vector<1x8xf32>
    %9 = vector.shape_cast %8 : vector<1x8xf32> to vector<1x8x1xf32>
    %cst_9 = arith.constant 3.200000e+01 : f32
    %10 = vector.broadcast %cst_9 : f32 to vector<1x8x1xf32>
    %11 = arith.divf %9, %10 : vector<1x8x1xf32>
    %12 = vector.broadcast %11 : vector<1x8x1xf32> to vector<1x8x32xf32>
    %13 = arith.subf %3, %12 : vector<1x8x32xf32>
    %14 = arith.mulf %13, %13 : vector<1x8x32xf32>
    %cst_10 = arith.constant dense<0.000000e+00> : vector<1x8xf32>
    %15 = vector.multi_reduction <add>, %14, %cst_10 [2] : vector<1x8x32xf32> to vector<1x8xf32>
    %16 = vector.shape_cast %15 : vector<1x8xf32> to vector<1x8x1xf32>
    %cst_11 = arith.constant 3.200000e+01 : f32
    %17 = vector.broadcast %cst_11 : f32 to vector<1x8x1xf32>
    %18 = arith.divf %16, %17 : vector<1x8x1xf32>
    %19 = vector.broadcast %11 : vector<1x8x1xf32> to vector<1x8x32xf32>
    %20 = arith.subf %3, %19 : vector<1x8x32xf32>
    %cst_12 = arith.constant 9.99999974E-6 : f32
    %21 = vector.broadcast %cst_12 : f32 to vector<1x8x1xf32>
    %22 = arith.addf %18, %21 : vector<1x8x1xf32>
    %23 = math.rsqrt %22 : vector<1x8x1xf32>
    %24 = vector.broadcast %23 : vector<1x8x1xf32> to vector<1x8x32xf32>
    %25 = arith.mulf %20, %24 : vector<1x8x32xf32>
    %26 = vector.shape_cast %5 : vector<1x32xf32> to vector<1x1x32xf32>
    %27 = vector.broadcast %26 : vector<1x1x32xf32> to vector<1x8x32xf32>
    %28 = arith.mulf %25, %27 : vector<1x8x32xf32>
    %29 = vector.shape_cast %7 : vector<1x32xf32> to vector<1x1x32xf32>
    %30 = vector.broadcast %29 : vector<1x1x32xf32> to vector<1x8x32xf32>
    %31 = arith.addf %28, %30 : vector<1x8x32xf32>
    %32 = vector.shape_cast %31 : vector<1x8x32xf32> to vector<8x32xf32>
    %33 = arith.truncf %32 : vector<8x32xf32> to vector<8x32xbf16>
    %34 = vector.shape_cast %33 : vector<8x32xbf16> to vector<1x8x32xbf16>
    %35 = vector.shape_cast %34 : vector<1x8x32xbf16> to vector<1x8x32xbf16>
    %36 = vector.broadcast %35 : vector<1x8x32xbf16> to vector<4x8x32xbf16>
    %c0_13 = arith.constant 0 : index
    %c0_14 = arith.constant 0 : index
    %c0_15 = arith.constant 0 : index
    %c0_16 = arith.constant 0 : index
    %37 = vector.load %arg6[%c0_13, %c0_14, %c0_15, %c0_16] : memref<1x4x32x24xbf16, #tpu.memory_space<vmem>>, vector<1x4x32x24xbf16>
    %38 = vector.shape_cast %37 : vector<1x4x32x24xbf16> to vector<4x32x24xbf16>
    "tpu.trace_start"() <{level = 10 : i32, message = "htc,hcx->htx"}> : () -> ()
    %cst_17 = arith.constant dense<0.000000e+00> : vector<4x8x24xf32>
    %39 = tpu.matmul %36, %38, %cst_17 {dimension_numbers = #tpu.dot_dimension_numbers<[2], [1], [1], [2], [0, 0, 0, 1, 1, 2], [0], [0]>} : vector<4x8x32xbf16>, vector<4x32x24xbf16>, vector<4x8x24xf32> -> vector<4x8x24xf32>
    "tpu.trace_stop"() : () -> ()
    %40 = vector.extract_strided_slice %39 {offsets = [0, 0, 0], sizes = [4, 8, 8], strides = [1, 1, 1]} : vector<4x8x24xf32> to vector<4x8x8xf32>
    %41 = arith.truncf %40 : vector<4x8x8xf32> to vector<4x8x8xbf16>
    %42 = vector.extract_strided_slice %39 {offsets = [0, 0, 8], sizes = [4, 8, 8], strides = [1, 1, 1]} : vector<4x8x24xf32> to vector<4x8x8xf32>
    %43 = arith.truncf %42 : vector<4x8x8xf32> to vector<4x8x8xbf16>
    %44 = vector.extract_strided_slice %39 {offsets = [0, 0, 16], sizes = [4, 8, 8], strides = [1, 1, 1]} : vector<4x8x24xf32> to vector<4x8x8xf32>
    %45 = arith.truncf %44 : vector<4x8x8xf32> to vector<4x8x8xbf16>
    "tpu.trace_start"() <{level = 10 : i32, message = "znd,zmd->znm"}> : () -> ()
    %cst_18 = arith.constant dense<0.000000e+00> : vector<4x8x8xf32>
    %46 = tpu.matmul %41, %43, %cst_18 {dimension_numbers = #tpu.dot_dimension_numbers<[2], [2], [1], [1], [0, 0, 0, 1, 1, 1], [0], [0]>} : vector<4x8x8xbf16>, vector<4x8x8xbf16>, vector<4x8x8xf32> -> vector<4x8x8xf32>
    "tpu.trace_stop"() : () -> ()
    %cst_19 = arith.constant dense<0xFF800000> : vector<4x8xf32>
    %47 = vector.multi_reduction <maximumf>, %46, %cst_19 [2] : vector<4x8x8xf32> to vector<4x8xf32>
    %48 = vector.shape_cast %47 : vector<4x8xf32> to vector<4x8x1xf32>
    %49 = vector.broadcast %48 : vector<4x8x1xf32> to vector<4x8x8xf32>
    %50 = arith.subf %46, %49 : vector<4x8x8xf32>
    %51 = math.exp %50 : vector<4x8x8xf32>
    %cst_20 = arith.constant dense<0.000000e+00> : vector<4x8xf32>
    %52 = vector.multi_reduction <add>, %51, %cst_20 [2] : vector<4x8x8xf32> to vector<4x8xf32>
    %53 = vector.shape_cast %52 : vector<4x8xf32> to vector<4x8x1xf32>
    %54 = vector.broadcast %53 : vector<4x8x1xf32> to vector<4x8x8xf32>
    %55 = arith.divf %51, %54 : vector<4x8x8xf32>
    %56 = arith.truncf %55 : vector<4x8x8xf32> to vector<4x8x8xbf16>
    "tpu.trace_start"() <{level = 10 : i32, message = "znm,zmd->znd"}> : () -> ()
    %cst_21 = arith.constant dense<0.000000e+00> : vector<4x8x8xf32>
    %57 = tpu.matmul %56, %45, %cst_21 {dimension_numbers = #tpu.dot_dimension_numbers<[2], [1], [1], [2], [0, 0, 0, 1, 1, 2], [0], [0]>} : vector<4x8x8xbf16>, vector<4x8x8xbf16>, vector<4x8x8xf32> -> vector<4x8x8xf32>
    "tpu.trace_stop"() : () -> ()
    %58 = arith.truncf %57 : vector<4x8x8xf32> to vector<4x8x8xbf16>
    %c0_22 = arith.constant 0 : index
    %c0_23 = arith.constant 0 : index
    %c0_24 = arith.constant 0 : index
    %c0_25 = arith.constant 0 : index
    %59 = vector.load %arg7[%c0_22, %c0_23, %c0_24, %c0_25] : memref<1x4x8x32xbf16, #tpu.memory_space<vmem>>, vector<1x4x8x32xbf16>
    %60 = vector.shape_cast %59 : vector<1x4x8x32xbf16> to vector<4x8x32xbf16>
    "tpu.trace_start"() <{level = 10 : i32, message = "htd,hdc->htc"}> : () -> ()
    %cst_26 = arith.constant dense<0.000000e+00> : vector<4x8x32xf32>
    %61 = tpu.matmul %58, %60, %cst_26 {dimension_numbers = #tpu.dot_dimension_numbers<[2], [1], [1], [2], [0, 0, 0, 1, 1, 2], [0], [0]>} : vector<4x8x8xbf16>, vector<4x8x32xbf16>, vector<4x8x32xf32> -> vector<4x8x32xf32>
    "tpu.trace_stop"() : () -> ()
    %cst_27 = arith.constant dense<0.000000e+00> : vector<8x32xf32>
    %62 = vector.multi_reduction <add>, %61, %cst_27 [0] : vector<4x8x32xf32> to vector<8x32xf32>
    %c0_28 = arith.constant 0 : index
    %c0_29 = arith.constant 0 : index
    %c0_30 = arith.constant 0 : index
    %63 = vector.load %arg8[%c0_28, %c0_29, %c0_30] : memref<1x1x32xf32, #tpu.memory_space<vmem>>, vector<1x1x32xf32>
    %64 = vector.shape_cast %63 : vector<1x1x32xf32> to vector<1x32xf32>
    %65 = vector.broadcast %64 : vector<1x32xf32> to vector<8x32xf32>
    %66 = arith.addf %62, %65 : vector<8x32xf32>
    %67 = vector.shape_cast %66 : vector<8x32xf32> to vector<1x8x32xf32>
    %68 = arith.addf %3, %67 : vector<1x8x32xf32>
    %c0_31 = arith.constant 0 : index
    %c0_32 = arith.constant 0 : index
    %c0_33 = arith.constant 0 : index
    %69 = vector.load %arg9[%c0_31, %c0_32, %c0_33] : memref<1x1x32xf32, #tpu.memory_space<vmem>>, vector<1x1x32xf32>
    %70 = vector.shape_cast %69 : vector<1x1x32xf32> to vector<1x32xf32>
    %c0_34 = arith.constant 0 : index
    %c0_35 = arith.constant 0 : index
    %c0_36 = arith.constant 0 : index
    %71 = vector.load %arg10[%c0_34, %c0_35, %c0_36] : memref<1x1x32xf32, #tpu.memory_space<vmem>>, vector<1x1x32xf32>
    %72 = vector.shape_cast %71 : vector<1x1x32xf32> to vector<1x32xf32>
    %cst_37 = arith.constant dense<0.000000e+00> : vector<1x8xf32>
    %73 = vector.multi_reduction <add>, %68, %cst_37 [2] : vector<1x8x32xf32> to vector<1x8xf32>
    %74 = vector.shape_cast %73 : vector<1x8xf32> to vector<1x8x1xf32>
    %cst_38 = arith.constant 3.200000e+01 : f32
    %75 = vector.broadcast %cst_38 : f32 to vector<1x8x1xf32>
    %76 = arith.divf %74, %75 : vector<1x8x1xf32>
    %77 = vector.broadcast %76 : vector<1x8x1xf32> to vector<1x8x32xf32>
    %78 = arith.subf %68, %77 : vector<1x8x32xf32>
    %79 = arith.mulf %78, %78 : vector<1x8x32xf32>
    %cst_39 = arith.constant dense<0.000000e+00> : vector<1x8xf32>
    %80 = vector.multi_reduction <add>, %79, %cst_39 [2] : vector<1x8x32xf32> to vector<1x8xf32>
    %81 = vector.shape_cast %80 : vector<1x8xf32> to vector<1x8x1xf32>
    %cst_40 = arith.constant 3.200000e+01 : f32
    %82 = vector.broadcast %cst_40 : f32 to vector<1x8x1xf32>
    %83 = arith.divf %81, %82 : vector<1x8x1xf32>
    %84 = vector.broadcast %76 : vector<1x8x1xf32> to vector<1x8x32xf32>
    %85 = arith.subf %68, %84 : vector<1x8x32xf32>
    %cst_41 = arith.constant 9.99999974E-6 : f32
    %86 = vector.broadcast %cst_41 : f32 to vector<1x8x1xf32>
    %87 = arith.addf %83, %86 : vector<1x8x1xf32>
    %88 = math.rsqrt %87 : vector<1x8x1xf32>
    %89 = vector.broadcast %88 : vector<1x8x1xf32> to vector<1x8x32xf32>
    %90 = arith.mulf %85, %89 : vector<1x8x32xf32>
    %91 = vector.shape_cast %70 : vector<1x32xf32> to vector<1x1x32xf32>
    %92 = vector.broadcast %91 : vector<1x1x32xf32> to vector<1x8x32xf32>
    %93 = arith.mulf %90, %92 : vector<1x8x32xf32>
    %94 = vector.shape_cast %72 : vector<1x32xf32> to vector<1x1x32xf32>
    %95 = vector.broadcast %94 : vector<1x1x32xf32> to vector<1x8x32xf32>
    %96 = arith.addf %93, %95 : vector<1x8x32xf32>
    %97 = vector.shape_cast %96 : vector<1x8x32xf32> to vector<8x32xf32>
    %98 = arith.truncf %97 : vector<8x32xf32> to vector<8x32xbf16>
    %c0_42 = arith.constant 0 : index
    %c0_43 = arith.constant 0 : index
    %c0_44 = arith.constant 0 : index
    %99 = vector.load %arg11[%c0_42, %c0_43, %c0_44] : memref<1x32x128xbf16, #tpu.memory_space<vmem>>, vector<1x32x128xbf16>
    %100 = vector.shape_cast %99 : vector<1x32x128xbf16> to vector<32x128xbf16>
    %cst_45 = arith.constant dense<0.000000e+00> : vector<8x128xf32>
    %101 = tpu.matmul %98, %100, %cst_45 {dimension_numbers = #tpu.dot_dimension_numbers<[1], [0], [0], [1], [0, 0, 1, 1], [], []>} : vector<8x32xbf16>, vector<32x128xbf16>, vector<8x128xf32> -> vector<8x128xf32>
    %c0_46 = arith.constant 0 : index
    %c0_47 = arith.constant 0 : index
    %c0_48 = arith.constant 0 : index
    %102 = vector.load %arg12[%c0_46, %c0_47, %c0_48] : memref<1x1x128xf32, #tpu.memory_space<vmem>>, vector<1x1x128xf32>
    %103 = vector.shape_cast %102 : vector<1x1x128xf32> to vector<1x128xf32>
    %104 = vector.broadcast %103 : vector<1x128xf32> to vector<8x128xf32>
    %105 = arith.addf %101, %104 : vector<8x128xf32>
    %cst_49 = arith.constant 5.000000e-01 : f32
    %106 = vector.broadcast %cst_49 : f32 to vector<8x128xf32>
    %107 = arith.mulf %106, %105 : vector<8x128xf32>
    %cst_50 = arith.constant 0.707106769 : f32
    %108 = vector.broadcast %cst_50 : f32 to vector<8x128xf32>
    %109 = arith.mulf %105, %108 : vector<8x128xf32>
    %110 = math.erf %109 : vector<8x128xf32>
    %cst_51 = arith.constant 1.000000e+00 : f32
    %111 = vector.broadcast %cst_51 : f32 to vector<8x128xf32>
    %112 = arith.addf %111, %110 : vector<8x128xf32>
    %113 = arith.mulf %107, %112 : vector<8x128xf32>
    %114 = arith.truncf %113 : vector<8x128xf32> to vector<8x128xbf16>
    %c0_52 = arith.constant 0 : index
    %c0_53 = arith.constant 0 : index
    %c0_54 = arith.constant 0 : index
    %115 = vector.load %arg13[%c0_52, %c0_53, %c0_54] : memref<1x128x32xbf16, #tpu.memory_space<vmem>>, vector<1x128x32xbf16>
    %116 = vector.shape_cast %115 : vector<1x128x32xbf16> to vector<128x32xbf16>
    %cst_55 = arith.constant dense<0.000000e+00> : vector<8x32xf32>
    %117 = tpu.matmul %114, %116, %cst_55 {dimension_numbers = #tpu.dot_dimension_numbers<[1], [0], [0], [1], [0, 0, 1, 1], [], []>} : vector<8x128xbf16>, vector<128x32xbf16>, vector<8x32xf32> -> vector<8x32xf32>
    %c0_56 = arith.constant 0 : index
    %c0_57 = arith.constant 0 : index
    %c0_58 = arith.constant 0 : index
    %118 = vector.load %arg14[%c0_56, %c0_57, %c0_58] : memref<1x1x32xf32, #tpu.memory_space<vmem>>, vector<1x1x32xf32>
    %119 = vector.shape_cast %118 : vector<1x1x32xf32> to vector<1x32xf32>
    %120 = vector.broadcast %119 : vector<1x32xf32> to vector<8x32xf32>
    %121 = arith.addf %117, %120 : vector<8x32xf32>
    %122 = vector.shape_cast %121 : vector<8x32xf32> to vector<1x8x32xf32>
    %123 = arith.addf %96, %122 : vector<1x8x32xf32>
    %c0_59 = arith.constant 0 : index
    %c0_60 = arith.constant 0 : index
    %c0_61 = arith.constant 0 : index
    %124 = vector.load %arg22[%c0_59, %c0_60, %c0_61] : memref<1x8x32xf32, #tpu.memory_space<vmem>>, vector<1x8x32xf32>
    tpu.vector_store %arg22[%c0_59, %c0_60, %c0_61], %123 {strides = array<i32>} : memref<1x8x32xf32, #tpu.memory_space<vmem>>, vector<1x8x32xf32>,
    %c1_i32 = arith.constant 1 : i32
    %125 = arith.cmpi eq, %arg1, %c1_i32 : i32
    %126 = arith.extui %125 : i1 to i32
    %c0_i32_62 = arith.constant 0 : i32
    %127 = arith.cmpi ne, %126, %c0_i32_62 : i32
    scf.if %127 {
      %c0_63 = arith.constant 0 : index
      %c0_64 = arith.constant 0 : index
      %128 = vector.load %arg15[%c0_63, %c0_64] : memref<1x32xf32, #tpu.memory_space<vmem>>, vector<1x32xf32>
      %c0_65 = arith.constant 0 : index
      %c0_66 = arith.constant 0 : index
      %129 = vector.load %arg16[%c0_65, %c0_66] : memref<1x32xf32, #tpu.memory_space<vmem>>, vector<1x32xf32>
      %cst_67 = arith.constant dense<0.000000e+00> : vector<1x8xf32>
      %130 = vector.multi_reduction <add>, %123, %cst_67 [2] : vector<1x8x32xf32> to vector<1x8xf32>
      %131 = vector.shape_cast %130 : vector<1x8xf32> to vector<1x8x1xf32>
      %cst_68 = arith.constant 3.200000e+01 : f32
      %132 = vector.broadcast %cst_68 : f32 to vector<1x8x1xf32>
      %133 = arith.divf %131, %132 : vector<1x8x1xf32>
      %134 = vector.broadcast %133 : vector<1x8x1xf32> to vector<1x8x32xf32>
      %135 = arith.subf %123, %134 : vector<1x8x32xf32>
      %136 = arith.mulf %135, %135 : vector<1x8x32xf32>
      %cst_69 = arith.constant dense<0.000000e+00> : vector<1x8xf32>
      %137 = vector.multi_reduction <add>, %136, %cst_69 [2] : vector<1x8x32xf32> to vector<1x8xf32>
      %138 = vector.shape_cast %137 : vector<1x8xf32> to vector<1x8x1xf32>
      %cst_70 = arith.constant 3.200000e+01 : f32
      %139 = vector.broadcast %cst_70 : f32 to vector<1x8x1xf32>
      %140 = arith.divf %138, %139 : vector<1x8x1xf32>
      %141 = vector.broadcast %133 : vector<1x8x1xf32> to vector<1x8x32xf32>
      %142 = arith.subf %123, %141 : vector<1x8x32xf32>
      %cst_71 = arith.constant 9.99999974E-6 : f32
      %143 = vector.broadcast %cst_71 : f32 to vector<1x8x1xf32>
      %144 = arith.addf %140, %143 : vector<1x8x1xf32>
      %145 = math.rsqrt %144 : vector<1x8x1xf32>
      %146 = vector.broadcast %145 : vector<1x8x1xf32> to vector<1x8x32xf32>
      %147 = arith.mulf %142, %146 : vector<1x8x32xf32>
      %148 = vector.shape_cast %128 : vector<1x32xf32> to vector<1x1x32xf32>
      %149 = vector.broadcast %148 : vector<1x1x32xf32> to vector<1x8x32xf32>
      %150 = arith.mulf %147, %149 : vector<1x8x32xf32>
      %151 = vector.shape_cast %129 : vector<1x32xf32> to vector<1x1x32xf32>
      %152 = vector.broadcast %151 : vector<1x1x32xf32> to vector<1x8x32xf32>
      %153 = arith.addf %150, %152 : vector<1x8x32xf32>
      %c0_72 = arith.constant 0 : index
      %c0_73 = arith.constant 0 : index
      %c0_74 = arith.constant 0 : index
      %154 = vector.load %arg17[%c0_72, %c0_73, %c0_74] : memref<1x1x32xf32, #tpu.memory_space<vmem>>, vector<1x1x32xf32>
      %155 = vector.broadcast %154 : vector<1x1x32xf32> to vector<1x8x32xf32>
      %156 = arith.mulf %153, %155 : vector<1x8x32xf32>
      %cst_75 = arith.constant dense<0.000000e+00> : vector<1x8xf32>
      %157 = vector.multi_reduction <add>, %156, %cst_75 [2] : vector<1x8x32xf32> to vector<1x8xf32>
      %158 = vector.shape_cast %157 : vector<1x8xf32> to vector<1x8x1xf32>
      %c0_76 = arith.constant 0 : index
      %c0_77 = arith.constant 0 : index
      %c0_78 = arith.constant 0 : index
      %159 = vector.load %arg18[%c0_76, %c0_77, %c0_78] : memref<1x1x1xf32, #tpu.memory_space<vmem>>, vector<1x1x1xf32>
      %160 = vector.broadcast %159 : vector<1x1x1xf32> to vector<1x8x1xf32>
      %161 = arith.addf %158, %160 : vector<1x8x1xf32>
      %cst_79 = arith.constant dense<0xFF800000> : vector<1x1xf32>
      %162 = vector.multi_reduction <maximumf>, %161, %cst_79 [1] : vector<1x8x1xf32> to vector<1x1xf32>
      %163 = vector.shape_cast %162 : vector<1x1xf32> to vector<1x1x1xf32>
      %164 = vector.broadcast %163 : vector<1x1x1xf32> to vector<1x8x1xf32>
      %165 = arith.subf %161, %164 : vector<1x8x1xf32>
      %166 = math.exp %165 : vector<1x8x1xf32>
      %cst_80 = arith.constant dense<0.000000e+00> : vector<1x1xf32>
      %167 = vector.multi_reduction <add>, %166, %cst_80 [1] : vector<1x8x1xf32> to vector<1x1xf32>
      %168 = vector.shape_cast %167 : vector<1x1xf32> to vector<1x1x1xf32>
      %169 = vector.broadcast %168 : vector<1x1x1xf32> to vector<1x8x1xf32>
      %170 = arith.divf %166, %169 : vector<1x8x1xf32>
      %171 = vector.broadcast %170 : vector<1x8x1xf32> to vector<1x8x32xf32>
      %172 = arith.mulf %171, %153 : vector<1x8x32xf32>
      %cst_81 = arith.constant dense<0.000000e+00> : vector<1x32xf32>
      %173 = vector.multi_reduction <add>, %172, %cst_81 [1] : vector<1x8x32xf32> to vector<1x32xf32>
      %174 = arith.truncf %173 : vector<1x32xf32> to vector<1x32xbf16>
      %c0_82 = arith.constant 0 : index
      %c0_83 = arith.constant 0 : index
      %175 = vector.load %arg19[%c0_82, %c0_83] : memref<32x10xbf16, #tpu.memory_space<vmem>>, vector<32x10xbf16>
      %cst_84 = arith.constant dense<0.000000e+00> : vector<1x10xf32>
      %176 = tpu.matmul %174, %175, %cst_84 {dimension_numbers = #tpu.dot_dimension_numbers<[1], [0], [0], [1], [0, 0, 1, 1], [], []>} : vector<1x32xbf16>, vector<32x10xbf16>, vector<1x10xf32> -> vector<1x10xf32>
      %c0_85 = arith.constant 0 : index
      %c0_86 = arith.constant 0 : index
      %177 = vector.load %arg20[%c0_85, %c0_86] : memref<1x10xf32, #tpu.memory_space<vmem>>, vector<1x10xf32>
      %178 = arith.addf %176, %177 : vector<1x10xf32>
      %179 = vector.shape_cast %178 : vector<1x10xf32> to vector<1x1x10xf32>
      %c0_87 = arith.constant 0 : index
      %c0_88 = arith.constant 0 : index
      %c0_89 = arith.constant 0 : index
      %180 = vector.load %arg21[%c0_87, %c0_88, %c0_89] : memref<1x1x10xf32, #tpu.memory_space<vmem>>, vector<1x1x10xf32>
      tpu.vector_store %arg21[%c0_87, %c0_88, %c0_89], %179 {strides = array<i32>} : memref<1x1x10xf32, #tpu.memory_space<vmem>>, vector<1x1x10xf32>,
    } else {
    }
    return
  }
  func.func @transform_0(%arg0: i32, %arg1: i32) -> (i32, i32, i32) {
    %c0_i32 = arith.constant 0 : i32
    %c0_i32_0 = arith.constant 0 : i32
    %c0_i32_1 = arith.constant 0 : i32
    return %arg0, %c0_i32, %c0_i32_0 : i32, i32, i32
  }
  func.func @transform_1(%arg0: i32, %arg1: i32) -> (i32, i32, i32) {
    %c0_i32 = arith.constant 0 : i32
    %c0_i32_0 = arith.constant 0 : i32
    %c0_i32_1 = arith.constant 0 : i32
    %c0_i32_2 = arith.constant 0 : i32
    return %c0_i32, %c0_i32_0, %c0_i32_1 : i32, i32, i32
  }
  func.func @transform_2(%arg0: i32, %arg1: i32) -> (i32, i32, i32) {
    %c0_i32 = arith.constant 0 : i32
    %c0_i32_0 = arith.constant 0 : i32
    %c0_i32_1 = arith.constant 0 : i32
    return %arg1, %c0_i32, %c0_i32_0 : i32, i32, i32
  }
  func.func @transform_3(%arg0: i32, %arg1: i32) -> (i32, i32, i32) {
    %c0_i32 = arith.constant 0 : i32
    %c0_i32_0 = arith.constant 0 : i32
    %c0_i32_1 = arith.constant 0 : i32
    return %arg1, %c0_i32, %c0_i32_0 : i32, i32, i32
  }
  func.func @transform_4(%arg0: i32, %arg1: i32) -> (i32, i32, i32, i32) {
    %c0_i32 = arith.constant 0 : i32
    %c0_i32_0 = arith.constant 0 : i32
    %c0_i32_1 = arith.constant 0 : i32
    %c0_i32_2 = arith.constant 0 : i32
    return %arg1, %c0_i32, %c0_i32_0, %c0_i32_1 : i32, i32, i32, i32
  }
  func.func @transform_5(%arg0: i32, %arg1: i32) -> (i32, i32, i32, i32) {
    %c0_i32 = arith.constant 0 : i32
    %c0_i32_0 = arith.constant 0 : i32
    %c0_i32_1 = arith.constant 0 : i32
    %c0_i32_2 = arith.constant 0 : i32
    return %arg1, %c0_i32, %c0_i32_0, %c0_i32_1 : i32, i32, i32, i32
  }
  func.func @transform_6(%arg0: i32, %arg1: i32) -> (i32, i32, i32) {
    %c0_i32 = arith.constant 0 : i32
    %c0_i32_0 = arith.constant 0 : i32
    %c0_i32_1 = arith.constant 0 : i32
    return %arg1, %c0_i32, %c0_i32_0 : i32, i32, i32
  }
  func.func @transform_7(%arg0: i32, %arg1: i32) -> (i32, i32, i32) {
    %c0_i32 = arith.constant 0 : i32
    %c0_i32_0 = arith.constant 0 : i32
    %c0_i32_1 = arith.constant 0 : i32
    return %arg1, %c0_i32, %c0_i32_0 : i32, i32, i32
  }
  func.func @transform_8(%arg0: i32, %arg1: i32) -> (i32, i32, i32) {
    %c0_i32 = arith.constant 0 : i32
    %c0_i32_0 = arith.constant 0 : i32
    %c0_i32_1 = arith.constant 0 : i32
    return %arg1, %c0_i32, %c0_i32_0 : i32, i32, i32
  }
  func.func @transform_9(%arg0: i32, %arg1: i32) -> (i32, i32, i32) {
    %c0_i32 = arith.constant 0 : i32
    %c0_i32_0 = arith.constant 0 : i32
    %c0_i32_1 = arith.constant 0 : i32
    return %arg1, %c0_i32, %c0_i32_0 : i32, i32, i32
  }
  func.func @transform_10(%arg0: i32, %arg1: i32) -> (i32, i32, i32) {
    %c0_i32 = arith.constant 0 : i32
    %c0_i32_0 = arith.constant 0 : i32
    %c0_i32_1 = arith.constant 0 : i32
    return %arg1, %c0_i32, %c0_i32_0 : i32, i32, i32
  }
  func.func @transform_11(%arg0: i32, %arg1: i32) -> (i32, i32, i32) {
    %c0_i32 = arith.constant 0 : i32
    %c0_i32_0 = arith.constant 0 : i32
    %c0_i32_1 = arith.constant 0 : i32
    return %arg1, %c0_i32, %c0_i32_0 : i32, i32, i32
  }
  func.func @transform_12(%arg0: i32, %arg1: i32) -> (i32, i32, i32) {
    %c0_i32 = arith.constant 0 : i32
    %c0_i32_0 = arith.constant 0 : i32
    %c0_i32_1 = arith.constant 0 : i32
    return %arg1, %c0_i32, %c0_i32_0 : i32, i32, i32
  }
  func.func @transform_13(%arg0: i32, %arg1: i32) -> (i32, i32) {
    %c0_i32 = arith.constant 0 : i32
    %c0_i32_0 = arith.constant 0 : i32
    %c0_i32_1 = arith.constant 0 : i32
    return %c0_i32, %c0_i32_0 : i32, i32
  }
  func.func @transform_14(%arg0: i32, %arg1: i32) -> (i32, i32) {
    %c0_i32 = arith.constant 0 : i32
    %c0_i32_0 = arith.constant 0 : i32
    %c0_i32_1 = arith.constant 0 : i32
    return %c0_i32, %c0_i32_0 : i32, i32
  }
  func.func @transform_15(%arg0: i32, %arg1: i32) -> (i32, i32, i32) {
    %c0_i32 = arith.constant 0 : i32
    %c0_i32_0 = arith.constant 0 : i32
    %c0_i32_1 = arith.constant 0 : i32
    %c0_i32_2 = arith.constant 0 : i32
    return %c0_i32, %c0_i32_0, %c0_i32_1 : i32, i32, i32
  }
  func.func @transform_16(%arg0: i32, %arg1: i32) -> (i32, i32, i32) {
    %c0_i32 = arith.constant 0 : i32
    %c0_i32_0 = arith.constant 0 : i32
    %c0_i32_1 = arith.constant 0 : i32
    %c0_i32_2 = arith.constant 0 : i32
    return %c0_i32, %c0_i32_0, %c0_i32_1 : i32, i32, i32
  }
  func.func @transform_17(%arg0: i32, %arg1: i32) -> (i32, i32) {
    %c0_i32 = arith.constant 0 : i32
    %c0_i32_0 = arith.constant 0 : i32
    %c0_i32_1 = arith.constant 0 : i32
    return %c0_i32, %c0_i32_0 : i32, i32
  }
  func.func @transform_18(%arg0: i32, %arg1: i32) -> (i32, i32) {
    %c0_i32 = arith.constant 0 : i32
    %c0_i32_0 = arith.constant 0 : i32
    %c0_i32_1 = arith.constant 0 : i32
    return %c0_i32, %c0_i32_0 : i32, i32
  }
  func.func @transform_19(%arg0: i32, %arg1: i32) -> (i32, i32, i32) {
    %c0_i32 = arith.constant 0 : i32
    %c0_i32_0 = arith.constant 0 : i32
    %c0_i32_1 = arith.constant 0 : i32
    return %arg0, %c0_i32, %c0_i32_0 : i32, i32, i32
  }
}

</mosaic_0001>

<bundles_post_ra>
// kernel: tpu_custom_call.1
= control target key start
LH: loop header
LB: loop body
LE: loop exit
PB: predicated region body
PF: predicated region fallthrough
CT: control target
= control target key end

     0   :  { %s3274_s0 = inlined_call_operand.vmem [shape: f32[2,8,32], index: 0, kind: input, shape index: {}]   ;;  %s3275_s1 = inlined_call_operand.vmem [shape: f32[1,8,32], index: 1, kind: input, shape index: {}]   ;;  %s3276_s2 = inlined_call_operand.vmem [shape: f32[2,1,32], index: 2, kind: input, shape index: {}]   ;;  %s3277_s3 = inlined_call_operand.vmem [shape: f32[2,1,32], index: 3, kind: input, shape index: {}]   ;;  %s3278_s4 = inlined_call_operand.vmem [shape: bf16[2,4,32,24], index: 4, kind: input, shape index: {}]   ;;  %s3279_s5 = inlined_call_operand.vmem [shape: bf16[2,4,8,32], index: 5, kind: input, shape index: {}]   ;;  %s3280_s6 = inlined_call_operand.vmem [shape: f32[2,1,32], index: 6, kind: input, shape index: {}]   ;;  %s3281_s7 = inlined_call_operand.vmem [shape: f32[2,1,32], index: 7, kind: input, shape index: {}]   ;;  %s3282_s8 = inlined_call_operand.vmem [shape: f32[2,1,32], index: 8, kind: input, shape index: {}]   ;;  %s3283_s9 = inlined_call_operand.vmem [shape: bf16[2,32,128], index: 9, kind: input, shape index: {}]   ;;  %s3284_s10 = inlined_call_operand.vmem [shape: f32[2,1,128], index: 10, kind: input, shape index: {}]   ;;  %s3285_s11 = inlined_call_operand.vmem [shape: bf16[2,128,32], index: 11, kind: input, shape index: {}]   ;;  %s3286_s12 = inlined_call_operand.vmem [shape: f32[2,1,32], index: 12, kind: input, shape index: {}]   ;;  %s3287_s13 = inlined_call_operand.vmem [shape: f32[1,32], index: 13, kind: input, shape index: {}]   ;;  %s3288_s14 = inlined_call_operand.vmem [shape: f32[1,32], index: 14, kind: input, shape index: {}]   ;;  %s3289_s15 = inlined_call_operand.vmem [shape: f32[1,1,32], index: 15, kind: input, shape index: {}]   ;;  %s3290_s16 = inlined_call_operand.<no memory space> [shape: f32[1,1,1], index: 16, kind: input, shape index: {}]   ;;  %s3291_s17 = inlined_call_operand.vmem [shape: bf16[32,10], index: 17, kind: input, shape index: {}]   ;;  %s3292_s18 = inlined_call_operand.vmem [shape: f32[1,10], index: 18, kind: input, shape index: {}]   ;;  %s3293_s19 = inlined_call_operand.hbm [shape: f32[2,1,10], index: 19, kind: output, shape index: {}]  }
   0x1   :  { %3308 = sst [smem:[#allocation19_spill]] %s3274_s0  ;;  %v24_v0 = vstv %s3290_s16 }
   0x2   :  { %3309 = sst [smem:[#allocation20_spill]] %s3275_s1  ;;  %25 = vst [vmem:[#allocation3] sm:$0x1] %v24_v0 }
   0x3   :  { %3310 = sst [smem:[#allocation21_spill]] %s3276_s2 }
   0x4   :  { %3311 = sst [smem:[#allocation22_spill]] %s3277_s3 }
   0x5   :  { %3312 = sst [smem:[#allocation23_spill]] %s3278_s4 }
   0x6   :  { %3313 = sst [smem:[#allocation24_spill]] %s3287_s13 }
   0x7   :  { %3314 = sst [smem:[#allocation25_spill]] %s3288_s14 }
   0x8   :  { %3315 = sst [smem:[#allocation26_spill]] %s3289_s15 }
   0x9   :  { %3316 = sst [smem:[#allocation27_spill]] %s3291_s17 }
   0xa   :  { %3317 = sst [smem:[#allocation28_spill]] %s3292_s18 }
   0xb   :  { %3318 = sst [smem:[#allocation29_spill]] %s3293_s19 }
   0xc   :  { %26 = vsyncpa [#allocation5], 0 }
   0xd   :  { %28 = vsyncpa [#allocation5 + $0x1], 0  ;;  %s2860_s20 = smov 0   ;;  %s2862_s21 = smov 0  }
   0xe   :  { %s2864_s1 = smov 0   ;;  %s2866_s22 = smov 0  }
   0xf   :  { %s2868_s2 = smov 0   ;;  %s2870_s23 = smov 0  }
  0x10   :  { %s2872_s24 = smov 0   ;;  %s2874_s25 = smov 0  }
  0x11 LB: > { %3319 = sst [smem:[#allocation7_spill]] %s2719_s20  ;;  %s2262_s16 = sadd.s32 4294967295, %s2747_s25   ;;  %s2747_s25 = sphi %s2874_s25, %s34_s25   ;;  %s2743_s24 = sphi %s2872_s24, %s3366_s24   ;;  %s2739_s23 = sphi %s2870_s23, %s3365_s23   ;;  %s2735_s2 = sphi %s2868_s2, %s3364_s2   ;;  %s2731_s22 = sphi %s2866_s22, %s3363_s22   ;;  %s2727_s1 = sphi %s2864_s1, %s3362_s1   ;;  %s2723_s21 = sphi %s2862_s21, %s3368_s21   ;;  %s2719_s20 = sphi %s2860_s20, %s3367_s20  }
  0x12   : > { %3320 = sst [smem:[#allocation8_spill]] %s2727_s1  ;;  %s2263_s3 = sadd.s32 4294967294, %s2747_s25  }
  0x13   : > { %3321 = sst [smem:[#allocation9_spill]] %s2731_s22  ;;  %s43_s26 = sadd.s32 1, %s2739_s23 }
  0x14   : > { %3322 = sst [smem:[#allocation10_spill]] %s2735_s2  ;;  %p44_p0 = scmp.ge.s32.totalorder %s43_s26, 2 }
  0x15   : > { %3323 = sst [smem:[#allocation11_spill]] %s2739_s23  ;;  %s46_s27 = sadd.s32 1, %s2743_s24 }
  0x16   : > { %3324 = sst [smem:[#allocation12_spill]] %s2743_s24  ;;  %p522_p1 = scmp.ne.s32.totalorder %s2727_s1, %s2723_s21 }
  0x17   : > { %3325 = sst [smem:[#allocation13_spill]] %s2747_s25  ;;  %p523_p2 = scmp.eq.s32.totalorder %s2262_s16, 3 }
  0x18   : > { %s3370_s26 = smov (%p44_p0, %s43_s26), 0  ;;  %s3372_s27 = smov (!%p44_p0, %s46_s27), %s2743_s24 }
  0x19   : > { %3326 = sst [smem:[#allocation14_spill]] %s3370_s26  ;;  %p2909_p3 = por %p523_p2, %p522_p1 }
  0x1a   : > { %p528_p4 = scmp.ne.s32.totalorder %s2723_s21, %s2719_s20  ;;  %p48_p5 = scmp.ge.s32.totalorder %s3372_s27, 2 }
  0x1b   : > { %s3327_s28 = scalar_select %p2909_p3, 1, 0 }
  0x1c   : > { %p529_p6 = scmp.eq.s32.totalorder %s2263_s3, 3  ;;  %p2266_p7 = scmp.ge.s32.totalorder %s2747_s25, 1 }
  0x1d   : > { %3328 = sst [smem:[#allocation15_spill]] %s3327_s28  ;;  %p649_p8 = scmp.lt.s32.totalorder %s2747_s25, 5 }
  0x1e   : > { %s3374_s27 = smov (%p48_p5, %s3372_s27), 0  ;;  %p2919_p9 = por %p529_p6, %p528_p4 }
  0x1f   : > { %3329 = sst [smem:[#allocation16_spill]] %s3374_s27  ;;  %p650_p10 = pnand %p2266_p7, %p649_p8 }
  0x20   : > { %s3330_s29 = scalar_select %p2919_p9, 1, 0 }
  0x21   : > { %s509_s0 = ssub.s32 %s2743_s24, %s3374_s27  ;;  %s512_s30 = sadd.s32 1, %s2727_s1 }
  0x22   : > { %3331 = sst [smem:[#allocation17_spill]] %s3330_s29  ;;  %p510_p11 = scmp.eq.s32.totalorder %s509_s0, 0 }
  0x23   : > { %653 = sbr.rel (%p650_p10) target bundleno = 3366 (0xd26), region = 96  ;;  %p744_p12 = scmp.lt.s32.totalorder (!%p650_p10), %s2735_s2, 1 }
  0x24   : > { %s2927_s16 = scalar_select %p510_p11, %s2727_s1, %s512_s30  }
  0x25   : > { %p748_p13 = scmp.lt.s32.totalorder (!%p650_p10), %s2731_s22, 1  ;;  %s3333_s24 = sld [smem:[#allocation19_spill]] (!%p650_p10) }
  0x26   : > { %3332 = sst [smem:[#allocation18_spill]] %s2927_s16  ;;  %s3336_s4 = sld [smem:[#allocation23_spill]] (!%p650_p10) }
  0x27   : > { %s3337_s25 = sand.u32 (!%p650_p10), 1, %s2723_s21   ;;  %s3338_s15 = sld [smem:[#allocation9_spill]] (!%p650_p10) }
  0x28   : > { %s2991_s28 = scalar_lea.vmem (!%p650_p10), [#allocation4], %s3337_s25 }
  0x2a   : > { %s745_s26 = scalar_select %p744_p12, %s2735_s2, 1 }
  0x2b   : > { %s2934_s23 = scalar_select %p748_p13, %s2731_s22, 1 }
  0x2c   : > { %s2267_s0 = sshll.u32 %s745_s26, 3 }
  0x2d   : > { %s747_s3 = scalar_lea.vmem %s3333_s24, %s2267_s0  ;;  %s2330_s18 = sshll.u32 %s2934_s23, 6 }
  0x2e   : > { %s2951_s14 = scalar_lea.vmem %s3336_s4, %s2330_s18  ;;  %s2331_s13 = sshll.u32 %s2934_s23, 4 }
  0x2f   : > { %s2957_s27 = scalar_lea.vmem %s3279_s5, %s2331_s13  ;;  %s766_s1 = scalar_lea.vmem %s3280_s6, %s2934_s23 }
  0x30   : > { %s2974_s2 = scalar_lea.vmem %s3283_s9, %s2331_s13  ;;  %s780_s20 = scalar_lea.vmem %s3284_s10, %s2934_s23 }
  0x31   : > { %s2983_s0 = scalar_lea.vmem %s3285_s11, %s2330_s18  ;;  %s788_s19 = scalar_lea.vmem %s3286_s12, %s2934_s23 }
  0x32   : > { %p2276_p0 = scmp.ne.s32.totalorder %s3338_s15, 0 }
  0x33   : > { %v794_v1 = vld [vmem:[%s747_s3] sm:$0xff] (!%p2276_p0)  ;;  %s3339_s30 = sld [smem:[#allocation20_spill]] (!%p2276_p0)  ;;  %vm797_vm0 = vcmask (!%p2276_p0), 261120  }
  0x34   : > { %793 = sbr.rel (%p2276_p0) target bundleno = 61 (0x3d), region = 100 }
  0x39   : > { %v795_v2 = vld [vmem:[%s3339_s30] sm:$0xff] (!%p2276_p0) }
  0x3a   : > { %v796_v3 = vadd.f32 (!%p2276_p0), %v795_v2, %v794_v1 }
  0x3c   : > { %798 = vst.msk [vmem:[#allocation2] sm:$0xff] %vm797_vm0, %v796_v3 }
  0x3d PF: > { %vm802_vm1 = vcmask 261120   ;;  %v2603_v11 = vld [vmem:[%s2951_s14] sm:$0xff]   ;;  %v2604_v12 = vld [vmem:[%s2951_s14 + $0x30] sm:$0xff]   ;;  %v2749_v13 = vmov 0.0   ;;  %v2605_v14 = vld [vmem:[%s2951_s14 + $0x8] sm:$0xff]   ;;  %vm2750_vm2 = vmmov 0   ;;  %s3344_s13 = scalar_lea.vmem %s3281_s7, %s2934_s23  ;;  %s3345_s4 = scalar_lea.vmem %s3282_s8, %s2934_s23 }
  0x3e   : > { %2385 = vmatprep.subr.bf16.mxu0 %v2749_v13  ;;  %2409 = vmatprep.subr.bf16.mxu1 %v2749_v13  ;;  %v2606_v15 = vld [vmem:[%s2951_s14 + $0x38] sm:$0xff]   ;;  %s3340_s3 = sld [smem:[#allocation21_spill]]  ;;  %s3342_s24 = sld [smem:[#allocation22_spill]]  ;;  %v2607_v25 = vld [vmem:[%s2951_s14 + $0x10] sm:$0xff]   ;;  %v2609_v28 = vld [vmem:[%s2951_s14 + $0x20] sm:$0xff]   ;;  %vm1066_vm3 = vcmask 64512  }
  0x3f   : > { %2386 = vmatpush3.bf16.msra.mxu0 %v2603_v11  ;;  %2410 = vmatpush3.bf16.msra.mxu1 %v2604_v12  ;;  %v2608_v27 = vld [vmem:[%s2951_s14 + $0x18] sm:$0xff]   ;;  %v2610_v29 = vld [vmem:[%s2951_s14 + $0x28] sm:$0xff]   ;;  %s2751_s14 = smov 120   ;;  %s2752_s16 = smov 112   ;;  %vm1313_vm4 = vcmask 1043456  }
  0x40   : > { %2387 = vmatprep.subr.bf16.mxu0 %v2749_v13  ;;  %2411 = vmatprep.subr.bf16.mxu1 %v2749_v13 }
  0x41   : > { %2389 = vmatprep.mubr.msk.bf16.mxu0 %vm2750_vm2, %v2749_v13  ;;  %2413 = vmatprep.mubr.msk.bf16.mxu1 %vm2750_vm2, %v2749_v13 }
  0x43   : > { %v2997_v4 = vld [vmem:[#allocation2] sm:$0xff]  ;;  %2388 = vmatpush3.bf16.msra.mxu0 %v2605_v14  ;;  %2412 = vmatpush3.bf16.msra.mxu1 %v2606_v15 }
  0x44   : > { %v803_v5 = vsel %vm802_vm1, %v2997_v4, 0.0  ;;  %2393 = vmatprep.subr.bf16.mxu0 %v2749_v13  ;;  %2423 = vmatprep.subr.bf16.mxu1 %v2749_v13  ;;  %s3341_s15 = scalar_lea.vmem %s3340_s3, %s2934_s23  ;;  %s3343_s29 = scalar_lea.vmem %s3342_s24, %s2934_s23 }
  0x45   : > { %804 = vadd.xlane.f32.xlu0 %v803_v5  ;;  %v2277_v20 = vld [vmem:[%s3341_s15] ss:$0 sm:$0xff] }
  0x46   : > { %v2278_v22 = vld [vmem:[%s3343_s29] ss:$0 sm:$0xff] }
  0xd2   : > { %v805_v6 = vpop.xlane.xlu0 %804 }
  0xd3   : > { %v807_v7 = vmul.f32 0.03125, %v805_v6 }
  0xd5   : > { %v808_v8 = vsub.f32 %v2997_v4, %v807_v7 }
  0xd7   : > { %v809_v9 = vmul.f32 %v808_v8, %v808_v8 }
  0xd9   : > { %v810_v10 = vsel %vm802_vm1, %v809_v9, 0.0 }
  0xda   : > { %811 = vadd.xlane.f32.xlu0 %v810_v10 }
 0x167   : > { %v812_v16 = vpop.xlane.xlu0 %811 }
 0x168   : > { %v813_v17 = vmul.f32 0.03125, %v812_v16 }
 0x16a   : > { %v814_v18 = vadd.f32 1e-05, %v813_v17 }
 0x16c   : > { %2621 = vrsqrt.f32 %v814_v18 }
 0x176   : > { %v2622_v19 = vpop.eup %2621 }
 0x177   : > { %v816_v21 = vmul.f32 %v2622_v19, %v808_v8 }
 0x179   : > { %v823_v23 = vmul.f32 %v2277_v20, %v816_v21 }
 0x17b   : > { %v830_v24 = vadd.f32 %v2278_v22, %v823_v23 }
 0x17d   : > { %v831_v26 = vpack.c.bf16 %v830_v24, %v830_v24 }
 0x17f   : > { %2390 = vmatmul.mubr.msk.bf16.vlgmr.msra.gmra.mrb[0].mxu0 %vm802_vm1, %v831_v26  ;;  %2414 = vmatmul.mubr.msk.bf16.vlgmr.msra.gmra.mrb[0].mxu1 %vm802_vm1, %v831_v26 }
 0x180   : > { %2394 = vmatpush3.bf16.msra.mxu0 %v2607_v25  ;;  %2397 = vmatprep.mubr.msk.bf16.mxu0 %vm2750_vm2, %v2749_v13 }
 0x181   : > { %2395 = vmatprep.subr.bf16.mxu0 %v2749_v13  ;;  %2425 = vmatprep.mubr.msk.bf16.mxu1 %vm2750_vm2, %v2749_v13 }
 0x184   : > { %2396 = vmatpush3.bf16.msra.mxu0 %v2608_v27 }
 0x185   : > { %2401 = vmatprep.subr.bf16.mxu0 %v2749_v13 }
 0x187   : > { %2398 = vmatmul.mubr.msk.bf16.vlgmr.msra.gmra.mrb[4].mxu0 %vm802_vm1, %v831_v26 }
 0x188   : > { %2402 = vmatpush3.bf16.msra.mxu0 %v2609_v28  ;;  %2405 = vmatprep.mubr.msk.bf16.mxu0 %vm2750_vm2, %v2749_v13 }
 0x189   : > { %2403 = vmatprep.subr.bf16.mxu0 %v2749_v13 }
 0x18c   : > { %2404 = vmatpush3.bf16.msra.mxu0 %v2610_v29 }
 0x18d   : > { %2417 = vmatprep.subr.bf16.mxu0 %v2749_v13 }
 0x18f   : > { %2406 = vmatmul.mubr.msk.bf16.vlgmr.msra.gmra.mrb[8].mxu0 %vm802_vm1, %v831_v26 }
 0x190   : > { %2419 = vmatprep.mubr.msk.bf16.mxu0 %vm2750_vm2, %v2749_v13 }
 0x252   : > { %v897_v30 = vpop.f32.mrb[0].mxu0  ;;  %v1053_v31 = vpop.f32.mrb[0].mxu1 }
 0x253   : > { %v3047_v32 = vpack.c.bf16 %v897_v30, %v897_v30  ;;  %v2391_v33 = vpop.f32.mrb[1].mxu0  ;;  %v2415_v34 = vpop.f32.mrb[1].mxu1  ;;  %v3053_v44 = vpack.c.bf16 %v1053_v31, %v1053_v31 }
 0x254   : > { %v900_v35 = vpop.f32.mrb[2].mxu0  ;;  %v1056_v36 = vpop.f32.mrb[2].mxu1 }
 0x255   : > { %v2416_v37 = vpop.f32.mrb[3].mxu1  ;;  %1064 = vrot.lane.b32.xlu1 %v3047_v32, %s2751_s14  ;;  %v2392_v38 = vpop.f32.mrb[3].mxu0 }
 0x25a   : > { %v949_v39 = vpop.f32.mrb[4].mxu0 }
 0x25b   : > { %v3050_v40 = vpack.c.bf16 %v949_v39, %v949_v39  ;;  %v2399_v41 = vpop.f32.mrb[5].mxu0 }
 0x25c   : > { %v952_v42 = vpop.f32.mrb[6].mxu0 }
 0x25d   : > { %1114 = vrot.lane.b32.xlu1 %v3050_v40, %s2751_s14  ;;  %v2400_v43 = vpop.f32.mrb[7].mxu0 }
 0x261   : > { %1212 = vrot.lane.b32.xlu1 %v3053_v44, %s2751_s14 }
 0x262   : > { %v1001_v45 = vpop.f32.mrb[8].mxu0 }
 0x263   : > { %v3056_v46 = vpack.c.bf16 %v1001_v45, %v1001_v45  ;;  %v2407_v47 = vpop.f32.mrb[9].mxu0 }
 0x264   : > { %v1004_v48 = vpop.f32.mrb[10].mxu0 }
 0x265   : > { %1163 = vrot.lane.b32.xlu0 %v3056_v46, %s2751_s14  ;;  %v2408_v49 = vpop.f32.mrb[11].mxu0 }
 0x2c7   : > { %v1065_v50 = vpop.permute.xlu1 %1064 }
 0x2c8   : > { %v1071_v51 = vsel %vm1066_vm3, %v1065_v50, 0 }
 0x2c9   : > { %2418 = vmatpush3.bf16.xpose.msra.mxu0 %v1071_v51 }
 0x2ca   : > { %2429 = vmatprep.subr.bf16.mxu0 %v2749_v13 }
 0x2cf   : > { %v1115_v52 = vpop.permute.xlu1 %1114 }
 0x2d0   : > { %v1120_v53 = vsel %vm1066_vm3, %v1115_v52, 0  ;;  %2420 = vmatmul.mubr.msk.bf16.vlgmr.msra.gmra.mrb[12].mxu0 %vm1066_vm3, %v3047_v32 }
 0x2d1   : > { %2424 = vmatpush3.bf16.xpose.msra.mxu1 %v1120_v53  ;;  %2431 = vmatprep.mubr.msk.bf16.mxu0 %vm2750_vm2, %v2749_v13 }
 0x2d2   : > { %2435 = vmatprep.subr.bf16.mxu1 %v2749_v13 }
 0x2d3   : > { %v1213_v54 = vpop.permute.xlu1 %1212 }
 0x2d4   : > { %v1218_v56 = vsel %vm1066_vm3, %v1213_v54, 0 }
 0x2d7   : > { %v1164_v55 = vpop.permute.xlu0 %1163 }
 0x2d8   : > { %v1169_v57 = vsel %vm1066_vm3, %v1164_v55, 0  ;;  %2426 = vmatmul.mubr.msk.bf16.vlgmr.msra.gmra.mrb[4].mxu1 %vm1066_vm3, %v3050_v40 }
 0x2d9   : > { %2430 = vmatpush3.bf16.xpose.msra.mxu0 %v1169_v57  ;;  %2436 = vmatpush3.bf16.xpose.msra.mxu1 %v1218_v56 }
 0x2da   : > { %2437 = vmatprep.mubr.msk.bf16.mxu1 %vm2750_vm2, %v2749_v13  ;;  %2441 = vmatprep.subr.bf16.mxu0 %v2749_v13 }
 0x2db   : > { %2447 = vmatprep.subr.bf16.mxu1 %v2749_v13 }
 0x2e0   : > { %2432 = vmatmul.mubr.msk.bf16.vlgmr.msra.gmra.mrb[16].mxu0 %vm1066_vm3, %v3056_v46  ;;  %2438 = vmatmul.mubr.msk.bf16.vlgmr.msra.gmra.mrb[8].mxu1 %vm1066_vm3, %v3053_v44 }
 0x2e1   : > { %2443 = vmatprep.mubr.msk.bf16.mxu0 %vm2750_vm2, %v2749_v13  ;;  %2449 = vmatprep.mubr.msk.bf16.mxu1 %vm2750_vm2, %v2749_v13 }
 0x3a3   : > { %v1107_v58 = vpop.f32.mrb[12].mxu0 }
 0x3a4   : > { %v2421_v59 = vpop.f32.mrb[13].mxu0  ;;  %v1260_v60 = vsel %vm1066_vm3, %v1107_v58, -inf }
 0x3a5   : > { %1261 = vmax.xlane.f32.xlu1 %v1260_v60  ;;  %v1110_v61 = vpop.f32.mrb[14].mxu0  ;;  %v1505_v60 = vld [vmem:[%s2957_s27] sm:$0xf] }
 0x3a6   : > { %v2422_v62 = vpop.f32.mrb[15].mxu0  ;;  %v1513_v61 = vsel %vm1313_vm4, %v1505_v60, 0  ;;  %v2614_v60 = vld [vmem:[%s2983_s0 + $0x8] sm:$0xff]  }
 0x3a7   : > { %v1506_v62 = vld [vmem:[%s2957_s27 + $0x4] sm:$0xf] }
 0x3ab   : > { %v1156_v63 = vpop.f32.mrb[4].mxu1 }
 0x3ac   : > { %v2427_v0 = vpop.f32.mrb[5].mxu1  ;;  %v1263_v1 = vsel %vm1066_vm3, %v1156_v63, -inf }
 0x3ad   : > { %v1159_v2 = vpop.f32.mrb[6].mxu1  ;;  %1264 = vmax.xlane.f32.xlu0 %v1263_v1  ;;  %v1507_v0 = vld [vmem:[%s2957_s27 + $0x8] sm:$0xf] }
 0x3ae   : > { %v2428_v3 = vpop.f32.mrb[7].mxu1 }
 0x3b3   : > { %v1205_v5 = vpop.f32.mrb[16].mxu0  ;;  %v1254_v6 = vpop.f32.mrb[8].mxu1 }
 0x3b4   : > { %v2433_v7 = vpop.f32.mrb[17].mxu0  ;;  %v2439_v8 = vpop.f32.mrb[9].mxu1  ;;  %v1266_v9 = vsel %vm1066_vm3, %v1205_v5, -inf  ;;  %v1269_v15 = vsel %vm1066_vm3, %v1254_v6, -inf }
 0x3b5   : > { %v1257_v10 = vpop.f32.mrb[10].mxu1  ;;  %1267 = vmax.xlane.f32.xlu1 %v1266_v9  ;;  %v1208_v11 = vpop.f32.mrb[18].mxu0  ;;  %v1508_v8 = vld [vmem:[%s2957_s27 + $0xc] sm:$0xf] }
 0x3b6   : > { %v2434_v12 = vpop.f32.mrb[19].mxu0  ;;  %v2440_v14 = vpop.f32.mrb[11].mxu1 }
 0x3b7   : > { %v1651_v12 = vsel %vm1313_vm4, %v1508_v8, 0 }
 0x3b9   : > { %1270 = vmax.xlane.f32.xlu1 %v1269_v15 }
 0x3c3   : > { %1308 = vrot.lane.b32.xlu0 %v3047_v32, %s2752_s16 }
 0x3ca   : > { %1357 = vrot.lane.b32.xlu1 %v3050_v40, %s2752_s16 }
 0x432   : > { %v1262_v16 = vpop.xlane.xlu1 %1261 }
 0x433   : > { %v1272_v17 = vsub.f32 %v1107_v58, %v1262_v16 }
 0x435   : > { %v1276_v18 = vmul.f32 1.442695, %v1272_v17 }
 0x437   : > { %2623 = vpow2.f32 %v1276_v18 }
 0x43a   : > { %v1265_v19 = vpop.xlane.xlu0 %1264 }
 0x43b   : > { %v1273_v20 = vsub.f32 %v1156_v63, %v1265_v19  ;;  %v1559_v63 = vsel %vm1313_vm4, %v1506_v62, 0 }
 0x43d   : > { %v1278_v21 = vmul.f32 1.442695, %v1273_v20 }
 0x43e   : > { %v1309_v22 = vpop.permute.xlu0 %1308 }
 0x43f   : > { %2625 = vpow2.f32 %v1278_v21  ;;  %v1315_v23 = vsel %vm1313_vm4, %v1309_v22, 0 }
 0x440   : > { %2442 = vmatpush3.bf16.msra.mxu0 %v1315_v23 }
 0x441   : > { %v2624_v24 = vpop.eup %2623  ;;  %2453 = vmatprep.subr.bf16.mxu0 %v2749_v13 }
 0x442   : > { %v1268_v25 = vpop.xlane.xlu1 %1267  ;;  %v1284_v26 = vsel %vm1066_vm3, %v2624_v24, 0.0 }
 0x443   : > { %v1274_v27 = vsub.f32 %v1205_v5, %v1268_v25  ;;  %1285 = vadd.xlane.f32.xlu1 %v1284_v26  ;;  %v1605_v5 = vsel %vm1313_vm4, %v1507_v0, 0 }
 0x445   : > { %v1280_v28 = vmul.f32 1.442695, %v1274_v27 }
 0x446   : > { %v1271_v29 = vpop.xlane.xlu1 %1270 }
 0x447   : > { %2627 = vpow2.f32 %v1280_v28  ;;  %v1275_v30 = vsub.f32 %v1254_v6, %v1271_v29 }
 0x449   : > { %v2626_v31 = vpop.eup %2625  ;;  %v1282_v32 = vmul.f32 1.442695, %v1275_v30 }
 0x44a   : > { %v1358_v33 = vpop.permute.xlu1 %1357  ;;  %v1287_v34 = vsel %vm1066_vm3, %v2626_v31, 0.0 }
 0x44b   : > { %2629 = vpow2.f32 %v1282_v32  ;;  %v1363_v35 = vsel %vm1313_vm4, %v1358_v33, 0  ;;  %1288 = vadd.xlane.f32.xlu1 %v1287_v34 }
 0x44c   : > { %2448 = vmatpush3.bf16.msra.mxu1 %v1363_v35 }
 0x44d   : > { %2459 = vmatprep.subr.bf16.mxu1 %v2749_v13 }
 0x451   : > { %v2628_v36 = vpop.eup %2627 }
 0x452   : > { %v1290_v37 = vsel %vm1066_vm3, %v2628_v36, 0.0 }
 0x453   : > { %1291 = vadd.xlane.f32.xlu0 %v1290_v37 }
 0x455   : > { %v2630_v38 = vpop.eup %2629 }
 0x456   : > { %v1293_v39 = vsel %vm1066_vm3, %v2630_v38, 0.0 }
 0x457   : > { %1294 = vadd.xlane.f32.xlu1 %v1293_v39 }
 0x468   : > { %1405 = vrot.lane.b32.xlu1 %v3056_v46, %s2752_s16 }
 0x469   : > { %1453 = vrot.lane.b32.xlu0 %v3053_v44, %s2752_s16 }
 0x4d0   : > { %v1286_v40 = vpop.xlane.xlu1 %1285 }
 0x4d1   : > { %2631 = vrcp.f32 %v1286_v40 }
 0x4d8   : > { %v1289_v41 = vpop.xlane.xlu1 %1288 }
 0x4d9   : > { %2633 = vrcp.f32 %v1289_v41 }
 0x4db   : > { %v2632_v42 = vpop.eup %2631 }
 0x4dc   : > { %v1297_v43 = vmul.f32 %v2632_v42, %v2624_v24 }
 0x4de   : > { %v1304_v45 = vpack.c.bf16 %v1297_v43, %v1297_v43 }
 0x4e0   : > { %v1292_v47 = vpop.xlane.xlu0 %1291  ;;  %2444 = vmatmul.mubr.msk.bf16.vlgmr.msra.gmra.mrb[20].mxu0 %vm1066_vm3, %v1304_v45 }
 0x4e1   : > { %2635 = vrcp.f32 %v1292_v47  ;;  %2455 = vmatprep.mubr.msk.bf16.mxu0 %vm2750_vm2, %v2749_v13  ;;  %v2303_v47 = vld [vmem:[%s766_s1] ss:$0 sm:$0xff] }
 0x4e3   : > { %v2634_v48 = vpop.eup %2633 }
 0x4e4   : > { %v1299_v49 = vmul.f32 %v2634_v48, %v2626_v31  ;;  %v1295_v46 = vpop.xlane.xlu1 %1294  ;;  %v1454_v50 = vpop.permute.xlu0 %1453 }
 0x4e5   : > { %2637 = vrcp.f32 %v1295_v46  ;;  %v1459_v51 = vsel %vm1313_vm4, %v1454_v50, 0 }
 0x4e6   : > { %v1305_v44 = vpack.c.bf16 %v1299_v49, %v1299_v49 }
 0x4e8   : > { %2450 = vmatmul.mubr.msk.bf16.vlgmr.msra.gmra.mrb[12].mxu1 %vm1066_vm3, %v1305_v44  ;;  %v1406_v52 = vpop.permute.xlu1 %1405 }
 0x4e9   : > { %2460 = vmatpush3.bf16.msra.mxu1 %v1459_v51  ;;  %v1411_v53 = vsel %vm1313_vm4, %v1406_v52, 0  ;;  %2461 = vmatprep.mubr.msk.bf16.mxu1 %vm2750_vm2, %v2749_v13 }
 0x4ea   : > { %2454 = vmatpush3.bf16.msra.mxu0 %v1411_v53  ;;  %2471 = vmatprep.subr.bf16.mxu1 %v2749_v13 }
 0x4eb   : > { %v2636_v54 = vpop.eup %2635  ;;  %2465 = vmatprep.subr.bf16.mxu0 %v2749_v13 }
 0x4ec   : > { %v1301_v55 = vmul.f32 %v2636_v54, %v2628_v36 }
 0x4ee   : > { %v1306_v56 = vpack.c.bf16 %v1301_v55, %v1301_v55 }
 0x4ef   : > { %v2638_v57 = vpop.eup %2637 }
 0x4f0   : > { %v1303_v58 = vmul.f32 %v2638_v57, %v2630_v38  ;;  %2456 = vmatmul.mubr.msk.bf16.vlgmr.msra.gmra.mrb[24].mxu0 %vm1066_vm3, %v1306_v56 }
 0x4f1   : > { %2467 = vmatprep.mubr.msk.bf16.mxu0 %vm2750_vm2, %v2749_v13  ;;  %2466 = vmatpush3.bf16.msra.mxu0 %v1513_v61  ;;  %v2615_v61 = vld [vmem:[%s2983_s0 + $0x10] sm:$0xff]  }
 0x4f2   : > { %v1307_v59 = vpack.c.bf16 %v1303_v58, %v1303_v58  ;;  %2477 = vmatprep.subr.bf16.mxu0 %v2749_v13  ;;  %v2611_v58 = vld [vmem:[%s2974_s2] sm:$0xff]  }
 0x4f4   : > { %2462 = vmatmul.mubr.msk.bf16.vlgmr.msra.gmra.mrb[16].mxu1 %vm1066_vm3, %v1307_v59  ;;  %v2612_v59 = vld [vmem:[%s2974_s2 + $0x8] sm:$0xff]  }
 0x4f5   : > { %2473 = vmatprep.mubr.msk.bf16.mxu1 %vm2750_vm2, %v2749_v13  ;;  %2472 = vmatpush3.bf16.msra.mxu1 %v1559_v63 }
 0x4f6   : > { %2483 = vmatprep.subr.bf16.mxu1 %v2749_v13 }
 0x5b3   : > { %v1351_v1 = vpop.f32.mrb[20].mxu0 }
 0x5b4   : > { %v1501_v2 = vpack.c.bf16 %v1351_v1, %v1351_v1  ;;  %v2445_v3 = vpop.f32.mrb[21].mxu0 }
 0x5b5   : > { %v1354_v6 = vpop.f32.mrb[22].mxu0 }
 0x5b6   : > { %v2446_v7 = vpop.f32.mrb[23].mxu0  ;;  %2468 = vmatmul.mubr.msk.bf16.vlgmr.msra.gmra.mrb[28].mxu0 %vm1066_vm3, %v1501_v2  ;;  %v2304_v2 = vld [vmem:[%s3344_s13] ss:$0 sm:$0xff] }
 0x5b7   : > { %2478 = vmatpush3.bf16.msra.mxu0 %v1605_v5  ;;  %2479 = vmatprep.mubr.msk.bf16.mxu0 %vm2750_vm2, %v2749_v13  ;;  %v2305_v5 = vld [vmem:[%s3345_s4] ss:$0 sm:$0xff] }
 0x5b8   : > { %2489 = vmatprep.subr.bf16.mxu0 %v2749_v13 }
 0x5bb   : > { %v1399_v9 = vpop.f32.mrb[12].mxu1 }
 0x5bc   : > { %v1502_v10 = vpack.c.bf16 %v1399_v9, %v1399_v9  ;;  %v2451_v11 = vpop.f32.mrb[13].mxu1  ;;  %v2616_v9 = vld [vmem:[%s2983_s0 + $0x18] sm:$0xff]  }
 0x5bd   : > { %v1402_v14 = vpop.f32.mrb[14].mxu1  ;;  %v2618_v11 = vld [vmem:[%s2983_s0 + $0x28] sm:$0xff]  }
 0x5be   : > { %v2452_v15 = vpop.f32.mrb[15].mxu1  ;;  %2474 = vmatmul.mubr.msk.bf16.vlgmr.msra.gmra.mrb[20].mxu1 %vm1066_vm3, %v1502_v10  ;;  %v2617_v10 = vld [vmem:[%s2983_s0 + $0x20] sm:$0xff]   ;;  %v2620_v14 = vld [vmem:[%s2983_s0 + $0x38] sm:$0xff]  }
 0x5bf   : > { %2484 = vmatpush3.bf16.msra.mxu1 %v1651_v12  ;;  %2485 = vmatprep.mubr.msk.bf16.mxu1 %vm2750_vm2, %v2749_v13  ;;  %v2619_v12 = vld [vmem:[%s2983_s0 + $0x30] sm:$0xff]   ;;  %v2306_v15 = vld [vmem:[%s780_s20] ss:$0 sm:$0xff]  ;;  %s3346_s20 = sld [smem:[#allocation9_spill]] }
 0x5c0   : > { %2497 = vmatprep.subr.bf16.mxu1 %v2749_v13 }
 0x5c3   : > { %v1447_v16 = vpop.f32.mrb[24].mxu0 }
 0x5c4   : > { %v1503_v17 = vpack.c.bf16 %v1447_v16, %v1447_v16  ;;  %v2457_v18 = vpop.f32.mrb[25].mxu0 }
 0x5c5   : > { %v1450_v19 = vpop.f32.mrb[26].mxu0  ;;  %p2319_p1 = scmp.ne.s32.totalorder %s3346_s20, 1 }
 0x5c6   : > { %v2458_v20 = vpop.f32.mrb[27].mxu0  ;;  %2480 = vmatmul.mubr.msk.bf16.vlgmr.msra.gmra.mrb[32].mxu0 %vm1066_vm3, %v1503_v17  ;;  %s3347_s22 = sld [smem:[#allocation24_spill]] (!%p2319_p1)  ;;  %s3348_s29 = sld [smem:[#allocation25_spill]] (!%p2319_p1)  ;;  %vm1976_vm5 = vcmask (!%p2319_p1), 7168   ;;  %vm2755_vm6 = vmmov (!%p2319_p1), 0   ;;  %vm2070_vm7 = vcmask (!%p2319_p1), 73728  }
 0x5c7   : > { %v1495_v21 = vpop.f32.mrb[16].mxu1  ;;  %2493 = vmatprep.mubr.msk.bf16.mxu0 %vm2750_vm2, %v2749_v13  ;;  %2490 = vmatpush3.bf16.msra.mxu0 %v2611_v58  ;;  %s3349_s27 = sld [smem:[#allocation26_spill]] (!%p2319_p1)  ;;  %s3350_s1 = sld [smem:[#allocation27_spill]] (!%p2319_p1) }
 0x5c8   : > { %v1504_v22 = vpack.c.bf16 %v1495_v21, %v1495_v21  ;;  %v2463_v23 = vpop.f32.mrb[17].mxu1  ;;  %2491 = vmatprep.subr.bf16.mxu0 %v2749_v13  ;;  %s3352_s3 = sld [smem:[#allocation28_spill]] (!%p2319_p1) }
 0x5c9   : > { %v1498_v24 = vpop.f32.mrb[18].mxu1 }
 0x5ca   : > { %v2464_v25 = vpop.f32.mrb[19].mxu1  ;;  %2486 = vmatmul.mubr.msk.bf16.vlgmr.msra.gmra.mrb[24].mxu1 %vm1066_vm3, %v1504_v22 }
 0x5cb   : > { %2513 = vmatprep.mubr.msk.bf16.mxu1 %vm2750_vm2, %v2749_v13  ;;  %2492 = vmatpush3.bf16.msra.mxu0 %v2612_v59 }
 0x5cd   : > { %s3351_s13 = smov (!%p2319_p1), %s3350_s1 }
 0x689   : > { %v1549_v26 = vpop.f32.mrb[28].mxu0 }
 0x68a   : > { %v2469_v27 = vpop.f32.mrb[29].mxu0  ;;  %v1693_v31 = vsel %vm802_vm1, %v1549_v26, 0.0  ;;  %v2310_v26 = vld [vmem:[%s788_s19] ss:$0 sm:$0xff] }
 0x68b   : > { %v1552_v28 = vpop.f32.mrb[30].mxu0 }
 0x68c   : > { %v2470_v29 = vpop.f32.mrb[31].mxu0 }
 0x691   : > { %v1595_v30 = vpop.f32.mrb[20].mxu1 }
 0x692   : > { %v1694_v32 = vsel %vm802_vm1, %v1595_v30, 0.0  ;;  %v2475_v33 = vpop.f32.mrb[21].mxu1 }
 0x693   : > { %v1695_v34 = vadd.f32 %v1694_v32, %v1693_v31  ;;  %v1598_v35 = vpop.f32.mrb[22].mxu1 }
 0x694   : > { %v2476_v36 = vpop.f32.mrb[23].mxu1 }
 0x699   : > { %v1641_v37 = vpop.f32.mrb[32].mxu0 }
 0x69a   : > { %v1696_v38 = vsel %vm802_vm1, %v1641_v37, 0.0  ;;  %v2481_v39 = vpop.f32.mrb[33].mxu0 }
 0x69b   : > { %v1697_v40 = vadd.f32 %v1696_v38, %v1695_v34  ;;  %v1644_v41 = vpop.f32.mrb[34].mxu0 }
 0x69c   : > { %v2482_v42 = vpop.f32.mrb[35].mxu0 }
 0x69d   : > { %v1687_v43 = vpop.f32.mrb[24].mxu1 }
 0x69e   : > { %v1698_v45 = vsel %vm802_vm1, %v1687_v43, 0.0  ;;  %v2487_v48 = vpop.f32.mrb[25].mxu1  ;;  %v2320_v43 = vld [vmem:[%s3347_s22] ss:$0 sm:$0xff] (!%p2319_p1) }
 0x69f   : > { %v1699_v49 = vadd.f32 %v1698_v45, %v1697_v40  ;;  %v1690_v46 = vpop.f32.mrb[26].mxu1 }
 0x6a0   : > { %v2488_v50 = vpop.f32.mrb[27].mxu1 }
 0x6a1   : > { %v1707_v44 = vadd.f32 %v2303_v47, %v1699_v49  ;;  %v2321_v47 = vld [vmem:[%s3348_s29] ss:$0 sm:$0xff] (!%p2319_p1) }
 0x6a2   : > { %v2322_v49 = vld [vmem:[%s3349_s27] ss:$0 sm:$0xff] (!%p2319_p1) }
 0x6a3   : > { %v1708_v51 = vadd.f32 %v1707_v44, %v2997_v4  ;;  %v2613_v4 = vld [vmem:[%s2983_s0] sm:$0xff]  }
 0x6a4   : > { %2498 = vmatpush3.bf16.msra.mxu1 %v2613_v4 }
 0x6a5   : > { %v1711_v52 = vsel %vm802_vm1, %v1708_v51, 0.0  ;;  %2499 = vmatprep.subr.bf16.mxu1 %v2749_v13 }
 0x6a6   : > { %1712 = vadd.xlane.f32.xlu1 %v1711_v52  ;;  %v2323_v52 = vld [vmem:[#allocation3] ss:$0 sm:$0xff] (!%p2319_p1) }
 0x6a8   : > { %2500 = vmatpush3.bf16.msra.mxu1 %v2614_v60 }
 0x6a9   : > { %2501 = vmatprep.subr.bf16.mxu1 %v2749_v13 }
 0x6ac   : > { %2502 = vmatpush3.bf16.msra.mxu1 %v2615_v61 }
 0x6ad   : > { %2503 = vmatprep.subr.bf16.mxu1 %v2749_v13 }
 0x6b0   : > { %2504 = vmatpush3.bf16.msra.mxu1 %v2616_v9 }
 0x6b1   : > { %2505 = vmatprep.subr.bf16.mxu1 %v2749_v13 }
 0x6b4   : > { %2506 = vmatpush3.bf16.msra.mxu1 %v2617_v10  ;;  %v2645_v10 = vld [vmem:[%s3350_s1] sm:$0xff] (!%p2319_p1)  }
 0x6b5   : > { %2507 = vmatprep.subr.bf16.mxu1 %v2749_v13 }
 0x6b8   : > { %2508 = vmatpush3.bf16.msra.mxu1 %v2618_v11  ;;  %v2754_v11 = vmov (!%p2319_p1), 0.0  }
 0x6b9   : > { %2509 = vmatprep.subr.bf16.mxu1 %v2749_v13  ;;  %2517 = vmatprep.subr.bf16.mxu0 (!%p2319_p1), %v2754_v11 }
 0x6bc   : > { %2510 = vmatpush3.bf16.msra.mxu1 %v2619_v12  ;;  %v2646_v12 = vld [vmem:[%s3351_s13 + $0x8] sm:$0xff] (!%p2319_p1)  }
 0x6bd   : > { %2511 = vmatprep.subr.bf16.mxu1 %v2749_v13 }
 0x6c0   : > { %2512 = vmatpush3.bf16.msra.mxu1 %v2620_v14 }
 0x733   : > { %v1713_v53 = vpop.xlane.xlu1 %1712 }
 0x734   : > { %v1714_v54 = vmul.f32 0.03125, %v1713_v53 }
 0x736   : > { %v1715_v55 = vsub.f32 %v1708_v51, %v1714_v54  ;;  %v2753_v51 = vmov (!%p2319_p1), 0  }
 0x737   : > { %2643 = vset.pattern.permute.xlu1 (!%p2319_p1), %v2753_v51  ;;  %2644 = vset.pattern.permute.xlu0 (!%p2319_p1), %v2753_v51 }
 0x738   : > { %v1716_v56 = vmul.f32 %v1715_v55, %v1715_v55 }
 0x73a   : > { %v1717_v57 = vsel %vm802_vm1, %v1716_v56, 0.0 }
 0x73b   : > { %1718 = vadd.xlane.f32.xlu0 %v1717_v57 }
 0x7c8   : > { %v1719_v62 = vpop.xlane.xlu0 %1718 }
 0x7c9   : > { %v1720_v63 = vmul.f32 0.03125, %v1719_v62 }
 0x7cb   : > { %v1721_v0 = vadd.f32 1e-05, %v1720_v63 }
 0x7cd   : > { %2639 = vrsqrt.f32 %v1721_v0 }
 0x7d7   : > { %v2640_v1 = vpop.eup %2639 }
 0x7d8   : > { %v1723_v3 = vmul.f32 %v2640_v1, %v1715_v55 }
 0x7da   : > { %v1730_v6 = vmul.f32 %v2304_v2, %v1723_v3 }
 0x7dc   : > { %v1737_v7 = vadd.f32 %v2305_v5, %v1730_v6 }
 0x7de   : > { %v1738_v8 = vpack.c.bf16 %v1737_v7, %v1737_v7 }
 0x7e0   : > { %2494 = vmatmul.mubr.msk.bf16.vlgmr.msra.gmra.mrb[36].mxu0 %vm802_vm1, %v1738_v8 }
 0x7e1   : > { %2518 = vmatpush3.bf16.msra.mxu0 (!%p2319_p1), %v2645_v10  ;;  %2521 = vmatprep.mubr.msk.bf16.mxu0 (!%p2319_p1), %vm2755_vm6, %v2754_v11 }
 0x7e2   : > { %2519 = vmatprep.subr.bf16.mxu0 (!%p2319_p1), %v2754_v11 }
 0x7e5   : > { %2520 = vmatpush3.bf16.msra.mxu0 (!%p2319_p1), %v2646_v12 }
 0x8b3   : > { %v1799_v16 = vpop.f32.mrb[36].mxu0 }
 0x8b4   : > { %v1800_v17 = vadd.f32 %v2306_v15, %v1799_v16  ;;  %v2495_v18 = vpop.f32.mrb[37].mxu0 }
 0x8b5   : > { %v1802_v19 = vpop.f32.mrb[38].mxu0 }
 0x8b6   : > { %v1806_v20 = vmul.f32 0.70710677, %v1800_v17  ;;  %v2496_v21 = vpop.f32.mrb[39].mxu0  ;;  %v1805_v23 = vmul.f32 0.5, %v1800_v17 }
 0x8b8   : > { %2641 = verf.f32 %v1806_v20 }
 0x8c2   : > { %v2642_v22 = vpop.eup %2641 }
 0x8c3   : > { %v1808_v24 = vadd.f32 1.0, %v2642_v22 }
 0x8c5   : > { %v1809_v25 = vmul.f32 %v1808_v24, %v1805_v23  ;;  %v2014_v24 = vld [vmem:[%s3352_s3] sm:$0x1] (!%p2319_p1) }
 0x8c7   : > { %v1810_v13 = vpack.c.bf16 %v1809_v25, %v1809_v25 }
 0x8c9   : > { %2514 = vmatmul.mubr.bf16.vlgmr.msra.gmra.mrb[28].mxu1 %v1810_v13 }
 0x99b   : > { %1927 = sbr.rel (%p2319_p1) target bundleno = 3339 (0xd0b), region = 104 }
 0x99c   : > { %v1916_v27 = vpop.f32.mrb[28].mxu1 }
 0x99d   : > { %v1917_v28 = vadd.f32 %v2310_v26, %v1916_v27  ;;  %v2515_v29 = vpop.f32.mrb[29].mxu1 }
 0x99e   : > { %v1919_v30 = vpop.f32.mrb[30].mxu1 }
 0x99f   : > { %v1922_v31 = vadd.f32 %v1917_v28, %v1737_v7  ;;  %v2516_v32 = vpop.f32.mrb[31].mxu1 }
 0x9a1   : > { %1923 = vst.msk [vmem:[#allocation2] sm:$0xff] %vm802_vm1, %v1922_v31  ;;  %v1930_v33 = vsel (!%p2319_p1), %vm802_vm1, %v1922_v31, 0.0 }
 0x9a2   : > { %1931 = vadd.xlane.f32.xlu0 %v1930_v33 }
 0xa2f   : > { %v1932_v34 = vpop.xlane.xlu0 %1931 }
 0xa30   : > { %v1933_v35 = vmul.f32 0.03125, %v1932_v34 }
 0xa32   : > { %v1934_v36 = vsub.f32 %v1922_v31, %v1933_v35 }
 0xa34   : > { %v1935_v37 = vmul.f32 %v1934_v36, %v1934_v36 }
 0xa36   : > { %v1936_v38 = vsel %vm802_vm1, %v1935_v37, 0.0 }
 0xa37   : > { %1937 = vadd.xlane.f32.xlu0 %v1936_v38 }
 0xac4   : > { %v1938_v39 = vpop.xlane.xlu0 %1937 }
 0xac5   : > { %v1939_v40 = vmul.f32 0.03125, %v1938_v39 }
 0xac7   : > { %v1940_v41 = vadd.f32 1e-05, %v1939_v40 }
 0xac9   : > { %2647 = vrsqrt.f32 %v1940_v41 }
 0xad3   : > { %v2648_v42 = vpop.eup %2647 }
 0xad4   : > { %v1942_v45 = vmul.f32 %v2648_v42, %v1934_v36 }
 0xad6   : > { %v1949_v48 = vmul.f32 %v2320_v43, %v1942_v45 }
 0xad8   : > { %v1956_v46 = vadd.f32 %v2321_v47, %v1949_v48 }
 0xada   : > { %v1964_v50 = vmul.f32 %v2322_v49, %v1956_v46 }
 0xadc   : > { %v1965_v44 = vsel %vm802_vm1, %v1964_v50, 0.0 }
 0xadd   : > { %1966 = vadd.xlane.f32.xlu1 %v1965_v44 }
 0xb6a   : > { %v1967_v53 = vpop.xlane.xlu1 %1966 }
 0xb6b   : > { %v1975_v54 = vadd.f32 %v2323_v52, %v1967_v53 }
 0xb6d   : > { %v1977_v55 = vsel %vm1976_vm5, %v1975_v54, -inf }
 0xb6e   : > { %v1978_v56 = vrot.slane %v1977_v55, 4 }
 0xb70   : > { %v1979_v57 = vmax.f32 %v1977_v55, %v1978_v56 }
 0xb72   : > { %v1980_v58 = vrot.slane %v1979_v57, 2 }
 0xb74   : > { %v1981_v59 = vmax.f32 %v1979_v57, %v1980_v58 }
 0xb76   : > { %v1982_v4 = vrot.slane %v1981_v59, 1 }
 0xb78   : > { %v1983_v60 = vmax.f32 %v1981_v59, %v1982_v4 }
 0xb7a   : > { %v1984_v61 = vsub.f32 %v1975_v54, %v1983_v60 }
 0xb7c   : > { %v1985_v62 = vmul.f32 1.442695, %v1984_v61 }
 0xb7e   : > { %2649 = vpow2.f32 %v1985_v62 }
 0xb88   : > { %v2650_v63 = vpop.eup %2649 }
 0xb89   : > { %v1987_v0 = vsel %vm1976_vm5, %v2650_v63, 0.0 }
 0xb8a   : > { %v1988_v1 = vrot.slane %v1987_v0, 4 }
 0xb8c   : > { %v1989_v2 = vadd.f32 %v1988_v1, %v1987_v0 }
 0xb8e   : > { %v1990_v3 = vrot.slane %v1989_v2, 2 }
 0xb90   : > { %v1991_v5 = vadd.f32 %v1990_v3, %v1989_v2 }
 0xb92   : > { %v1992_v6 = vrot.slane %v1991_v5, 1 }
 0xb94   : > { %v1993_v7 = vadd.f32 %v1992_v6, %v1991_v5 }
 0xb96   : > { %2651 = vrcp.f32 %v1993_v7 }
 0xba0   : > { %v2652_v8 = vpop.eup %2651 }
 0xba1   : > { %v1995_v9 = vmul.f32 %v2652_v8, %v2650_v63 }
 0xba3   : > { %1998 = vperm.xlu1 %2643, %v1995_v9  }
 0xc22   : > { %v1999_v14 = vpop.permute.xlu1 %1998 }
 0xc23   : > { %v2001_v15 = vmul.f32 %v1999_v14, %v1956_v46 }
 0xc25   : > { %v2002_v16 = vsel %vm802_vm1, %v2001_v15, 0.0 }
 0xc26   : > { %v2003_v17 = vrot.slane %v2002_v16, 4 }
 0xc28   : > { %v2004_v18 = vadd.f32 %v2003_v17, %v2002_v16 }
 0xc2a   : > { %v2005_v19 = vrot.slane %v2004_v18, 2 }
 0xc2c   : > { %v2006_v20 = vadd.f32 %v2005_v19, %v2004_v18 }
 0xc2e   : > { %v2007_v21 = vrot.slane %v2006_v20, 1 }
 0xc30   : > { %v2008_v22 = vadd.f32 %v2007_v21, %v2006_v20 }
 0xc32   : > { %v2009_v23 = vpack.c.bf16 %v2008_v22, %v2008_v22 }
 0xc34   : > { %2522 = vmatmul.mubr.msk.bf16.vlgmr.msra.gmra.mrb[0].mxu0 %vm802_vm1, %v2009_v23 }
 0xd07   : > { %v2064_v25 = vpop.f32.mrb[0].mxu0 }
 0xd08   : > { %v2065_v13 = vadd.f32 %v2064_v25, %v2014_v24  ;;  %v2523_v26 = vpop.f32.mrb[1].mxu0 }
 0xd09   : > { %v2067_v27 = vpop.f32.mrb[2].mxu0 }
 0xd0a   : > { %2071 = vst.msk [vmem:[%s2991_s28] sm:$0x1] %vm2070_vm7, %v2065_v13  ;;  %v2524_v28 = vpop.f32.mrb[3].mxu0 }
 0xd0b PF: > { %s3353_s0 = sld [smem:[#allocation10_spill]]  ;;  %s3355_s22 = sld [smem:[#allocation29_spill]] }
 0xd0c   : > { %s2085_s29 = sshll.u32 %s2991_s28, 4  ;;  %s3357_s14 = sand.u32 1, %s2723_s21   ;;  %s2086_s29 = int_to_ptr.vmem [resolvable:$true] %s2085_s29 }
 0xd0d   : > { %s2073_s16 = scalar_lea.sflag [#allocation5], %s3357_s14  ;;  %s2653_s27 = scalar_lea.vmem %s2086_s29, 16 }
 0xd0e   : > { %p2654_p2 = scmp.ne.s32.totalorder %s2086_s29, %s2653_s27  ;;  %s2756_s25 = smov [#allocation4]  }
 0xd0f   : > { %s2657_s2 = sshll.u32 %s2756_s25, 4  ;;  %s2658_s2 = int_to_ptr.vmem [resolvable:$false] %s2657_s2 }
 0xd10   : > { %p2655_p4 = pnand %p2654_p2, %p2909_p3  ;;  %s2659_s1 = scalar_lea.vmem %s2658_s2, 32 }
 0xd11   : > { %s2327_s20 = sshll.u32 %s3353_s0, 4  ;;  %s3356_s26 = smov %s3355_s22 }
 0xd12   : > { %s3224_s24 = scalar_lea.hbm %s3355_s22, %s2327_s20  ;;  %p2656_p5 = pneg %p2655_p4 }
 0xd13   : > { %p2660_p6 = scmp.lt.s32.totalorder %s2086_s29, %s2658_s2  ;;  %p2661_p7 = scmp.lt.s32.totalorder %s2659_s1, %s2653_s27 }
 0xd15   : > { %p2662_p8 = por %p2661_p7, %p2660_p6 }
 0xd17   : > { %p2663_p10 = pnand %p2662_p8, %p2656_p5 }
 0xd19   : > { %2666 = shalt.err (!%p2663_p10)
}
 0xd1a   : > { %s2667_s28 = scalar_lea.hbm %s3224_s24, 16  ;;  %s2671_s4 = scalar_lea.hbm %s3356_s26, 32 }
 0xd1b   : > { %p2668_p11 = scmp.ne.s32.totalorder %s3224_s24, %s2667_s28  ;;  %p2672_p0 = scmp.lt.u32.totalorder %s3224_s24, %s3356_s26 }
 0xd1c   : > { %p2673_p1 = scmp.lt.u32.totalorder %s2671_s4, %s2667_s28  ;;  %p2675_p4 = scmp.lt.u32.totalorder %s2667_s28, %s3224_s24 }
 0xd1d   : > { %p2669_p12 = pnand %p2668_p11, %p2909_p3 }
 0xd1e   : > { %p2674_p2 = por %p2673_p1, %p2672_p0 }
 0xd1f   : > { %p2670_p13 = pneg %p2669_p12 }
 0xd20   : > { %p2676_p5 = por %p2675_p4, %p2674_p2 }
 0xd22   : > { %p2677_p6 = pnand %p2676_p5, %p2670_p13 }
 0xd24   : > { %2680 = shalt.err (!%p2677_p6)
}
 0xd25   : > { %2525 = dma.vmem_to_hbm [thread:$0]  (%p2909_p3), %s2086_s29, 16, %s3224_s24, %s2073_s16  }
 0xd26 PF: > { %s3358_s0 = sld [smem:[#allocation13_spill]]  ;;  %s3359_s20 = sld [smem:[#allocation7_spill]] }
 0xd2c   : > { %p2531_p7 = scmp.ge.s32.totalorder %s3358_s0, 2  ;;  %s2097_s19 = sand.u32 1, %s3359_s20  }
 0xd2d   : > { %s2098_s22 = scalar_lea.sflag [#allocation5], %s2097_s19 }
 0xd2e   : > { %p2528_p8 = pnand %p2531_p7, %p2919_p9 }
 0xd30   : > { %2714 = dma.done.wait (!%p2528_p8), %s2098_s22, 16  }
 0xd31   : > { %2716 = vsyncadd (!%p2528_p8), %s2098_s22, 4294967280  ;;  %s34_s25 = sadd.s32 1, %s3358_s0   ;;  %s3361_s14 = sld [smem:[#allocation8_spill]] }
 0xd32   : > { %p31_p10 = scmp.ge.s32.totalorder %s34_s25, 6   ;;  %s3362_s1 = sld [smem:[#allocation18_spill]] }
 0xd33   : > { %s3363_s22 = sld [smem:[#allocation11_spill]]  ;;  %s3364_s2 = sld [smem:[#allocation12_spill]] }
 0xd34   : > { %s3365_s23 = sld [smem:[#allocation14_spill]]  ;;  %s3366_s24 = sld [smem:[#allocation16_spill]] }
 0xd35   : > { %s3367_s20 = smov %s2723_s21  ;;  %33 = sbr.rel (!%p31_p10) target bundleno = 17 (0x11), region = 172 }
 0xd37   : > { %s3368_s21 = smov %s3361_s14 }
 0xd3c   :  { %2102 = vsyncpa [#allocation5], 1 }
 0xd3d   :  { %2104 = vsyncpa [#allocation5 + $0x1], 1 }

</bundles_post_ra>
